<compile_context>
chip_gen: v7x
topology: tpu7x:2x2x1
jax: 0.10.0
libtpu: 0.0.40
codegen_flags: <defaults>
</compile_context>

<pallas_src>
import jax
import jax.numpy as jnp
from jax.experimental import pallas as pl
from jax.experimental.pallas import tpu as pltpu


def _round_up(x, m):
    return ((x + m - 1) // m) * m


def _vmem_limit_bytes():
    """Generation-aware VMEM limit: ~85% of physical capacity, capped at 112 MiB.

    v7x (64 MiB / TensorCore) -> ~54 MiB; v5e/v6e (128 MiB) -> ~109 MiB.
    Falls back to the smallest generation (v7x) if the query is unavailable.
    """
    cap = 64 * 1024 * 1024
    try:
        cap = int(pltpu.get_tpu_info().vmem_capacity_bytes)
    except Exception:
        pass
    return min(int(cap * 0.85), 112 * 1024 * 1024)


def _resident_spec(shape):
    """Full weight/bias resident in VMEM for every batch tile.

    Constant index_map -> single-buffer it (double-buffering a constant block
    only wastes VMEM)."""
    if hasattr(pl, "Buffered"):
        try:
            return pl.BlockSpec(shape, lambda i: (0, 0), pipeline_mode=pl.Buffered(1))
        except TypeError:
            pass
    return pl.BlockSpec(shape, lambda i: (0, 0))


def mlp_kernel(x_ref, w1_ref, b1_ref, w2_ref, b2_ref, w3_ref, b3_ref,
               w4_ref, b4_ref, o_ref):
    # Whole hot path (4 matmuls + biases + ReLUs) fused per batch tile.
    # MXU matmuls accumulate in f32; bias adds / ReLUs stay in f32 on the VPU.
    x = x_ref[...]

    h = jnp.dot(x, w1_ref[...], preferred_element_type=jnp.float32) + b1_ref[...]
    h = jnp.maximum(h, 0.0).astype(w2_ref.dtype)

    h = jnp.dot(h, w2_ref[...], preferred_element_type=jnp.float32) + b2_ref[...]
    h = jnp.maximum(h, 0.0).astype(w3_ref.dtype)

    h = jnp.dot(h, w3_ref[...], preferred_element_type=jnp.float32) + b3_ref[...]
    h = jnp.maximum(h, 0.0).astype(w4_ref.dtype)

    out = jnp.dot(h, w4_ref[...], preferred_element_type=jnp.float32) + b4_ref[...]
    o_ref[...] = out.astype(o_ref.dtype)


def mlp_forward(x, params, *, tile_m=512, compute_dtype=jnp.bfloat16):
    """x: (B, input_dim) float32. params: w1..w4 stored (in, out), b1..b4 (1, out).

    Equivalent to PyTorch nn.Sequential(Linear, ReLU, Linear, ReLU, Linear, ReLU, Linear)
    with y = x @ W + b (weights pre-transposed relative to PyTorch's (out, in)).
    Matmul inputs are cast to `compute_dtype` (bf16 by default); accumulation is f32.
    """
    B, in_dim = x.shape
    hidden = params["w1"].shape[1]
    out_dim = params["w4"].shape[1]

    compute_dtype = jnp.dtype(compute_dtype)
    itemsize = compute_dtype.itemsize
    # Row-tile alignment: 8 sublanes for f32, 16 for bf16 (sublane packing).
    row_align = 16 if compute_dtype == jnp.dtype(jnp.bfloat16) else 8
    # Lane-dense output stores; only pad when out_dim isn't already 128-aligned.
    out_pad = out_dim if out_dim % 128 == 0 else _round_up(out_dim, 128)

    # --- VMEM budget ------------------------------------------------------
    vmem_limit = _vmem_limit_bytes()
    weight_bytes = (in_dim * hidden + 2 * hidden * hidden + hidden * out_pad) * itemsize
    bias_bytes = (3 * hidden + out_pad) * 4
    resident_bytes = weight_bytes + bias_bytes  # single-buffered resident blocks
    tile_budget = int(vmem_limit * 0.9) - resident_bytes
    if tile_budget <= 0:
        # TODO(synk): add a hidden-dim-tiled (K/N-chunked) fallback with an f32 VMEM
        #             accumulator (extra 'arbitrary' grid axis / pltpu.emit_pipeline)
        #             for hidden sizes whose resident weights exceed the VMEM budget.
        raise ValueError(
            f"resident weights ({resident_bytes} B) exceed VMEM budget ({vmem_limit} B); "
            "hidden-dim tiling not implemented")

    def _tile_bytes(tm):
        # double-buffered x and out tiles + ~2 live f32 (tm, hidden) intermediates
        return (2 * tm * in_dim * itemsize
                + 2 * tm * out_pad * 4
                + 2 * tm * hidden * 4)

    # --- batch tiling -------------------------------------------------------
    tile_m = max(row_align, _round_up(min(tile_m, B), row_align))
    if B > 2 * row_align:
        # Guarantee >= 2 grid steps so both v7x TensorCores get work ("parallel" axis).
        tile_m = min(tile_m, _round_up(-(-B // 2), row_align))
    while tile_m > row_align and _tile_bytes(tile_m) > tile_budget:
        tile_m = max(row_align, _round_up(tile_m // 2, row_align))

    B_pad = _round_up(B, tile_m)

    # Pad batch (zero rows are independent; sliced off afterwards) and cast.
    xp = x if B_pad == B else jnp.pad(x, ((0, B_pad - B), (0, 0)))
    xp = xp.astype(compute_dtype)

    w1 = params["w1"].astype(compute_dtype)
    w2 = params["w2"].astype(compute_dtype)
    w3 = params["w3"].astype(compute_dtype)
    w4 = params["w4"].astype(compute_dtype)
    b1 = params["b1"].astype(jnp.float32)
    b2 = params["b2"].astype(jnp.float32)
    b3 = params["b3"].astype(jnp.float32)
    b4 = params["b4"].astype(jnp.float32)
    if out_pad != out_dim:
        w4 = jnp.pad(w4, ((0, 0), (0, out_pad - out_dim)))
        b4 = jnp.pad(b4, ((0, 0), (0, out_pad - out_dim)))

    grid = (B_pad // tile_m,)

    flops = 2 * B_pad * (in_dim * hidden + 2 * hidden * hidden + hidden * out_pad)
    bytes_accessed = (
        xp.size * xp.dtype.itemsize
        + sum(a.size * a.dtype.itemsize for a in (w1, b1, w2, b2, w3, b3, w4, b4))
        + B_pad * out_pad * 4)

    out = pl.pallas_call(
        mlp_kernel,
        out_shape=jax.ShapeDtypeStruct((B_pad, out_pad), jnp.float32),
        grid_spec=pltpu.PrefetchScalarGridSpec(
            num_scalar_prefetch=0,
            grid=grid,
            in_specs=[
                pl.BlockSpec((tile_m, in_dim), lambda i: (i, 0)),  # x tile over batch
                _resident_spec(w1.shape), _resident_spec(b1.shape),
                _resident_spec(w2.shape), _resident_spec(b2.shape),
                _resident_spec(w3.shape), _resident_spec(b3.shape),
                _resident_spec(w4.shape), _resident_spec(b4.shape),
            ],
            out_specs=pl.BlockSpec((tile_m, out_pad), lambda i: (i, 0)),
        ),
        compiler_params=pltpu.CompilerParams(
            dimension_semantics=("parallel",),
            vmem_limit_bytes=vmem_limit,
        ),
        cost_estimate=pl.CostEstimate(
            flops=flops, transcendentals=0, bytes_accessed=bytes_accessed),
    )(xp, w1, b1, w2, b2, w3, b3, w4, b4)

    return out[:B, :out_dim].astype(x.dtype)


def init_params(key, input_dim, output_dim, hidden_dim):
    dims = [(input_dim, hidden_dim),
            (hidden_dim, hidden_dim),
            (hidden_dim, hidden_dim),
            (hidden_dim, output_dim)]
    params = {}
    for idx, (din, dout) in enumerate(dims, start=1):
        key, kw, kb = jax.random.split(key, 3)
        # PyTorch Linear default init: U(-1/sqrt(in), 1/sqrt(in))
        bound = 1.0 / (din ** 0.5)
        params[f"w{idx}"] = jax.random.uniform(
            kw, (din, dout), jnp.float32, minval=-bound, maxval=bound)
        params[f"b{idx}"] = jax.random.uniform(
            kb, (1, dout), jnp.float32, minval=-bound, maxval=bound)
    return params


def mlp_reference(x, params):
    h = x
    for i in range(1, 4):
        h = jnp.maximum(h @ params[f"w{i}"] + params[f"b{i}"], 0.0)
    return h @ params["w4"] + params["b4"]


if __name__ == "__main__":
    key = jax.random.PRNGKey(0)
    # hidden_dim=512 matches the PyTorch module default (and fills the 2x256 MXU width).
    input_dim, hidden_dim, output_dim = 32, 512, 16
    kx, kx2, kp = jax.random.split(key, 3)
    params = init_params(kp, input_dim, output_dim, hidden_dim)

    # Small demo batch, f32 compute path: should match the reference tightly.
    x_small = jax.random.normal(kx, (8, input_dim), jnp.float32)
    ref_small = mlp_reference(x_small, params)
    out_f32 = jax.block_until_ready(
        mlp_forward(x_small, params, compute_dtype=jnp.float32))
    assert out_f32.shape == (8, output_dim)
    assert jnp.allclose(out_f32, ref_small, atol=1e-4, rtol=1e-4), "mismatch (f32)"

    # Default bf16 compute path (f32 accumulation): loose tolerance vs f32 reference.
    out_bf16 = jax.block_until_ready(mlp_forward(x_small, params))
    assert out_bf16.shape == (8, output_dim)
    assert jnp.allclose(out_bf16, ref_small, atol=5e-2, rtol=5e-2), "mismatch (bf16 small)"

    # Larger, non-divisible batch exercises batch padding and the >=2-step grid
    # (both v7x TensorCores) on the default bf16 path.
    x_big = jax.random.normal(kx2, (300, input_dim), jnp.float32)
    ref_big = mlp_reference(x_big, params)
    out_big = jax.block_until_ready(mlp_forward(x_big, params))
    assert out_big.shape == (300, output_dim)
    assert jnp.allclose(out_big, ref_big, atol=5e-2, rtol=5e-2), "mismatch (bf16 big)"

    print("KERNEL_OK")
</pallas_src>

<mosaic_0001>
module attributes {stable_mosaic.version = 11 : i64} {
  func.func @mlp_kernel(%arg0: i32, %arg1: memref<8x32xf32, #tpu.memory_space<vmem>>, %arg2: memref<32x512xf32, #tpu.memory_space<vmem>>, %arg3: memref<1x512xf32, #tpu.memory_space<vmem>>, %arg4: memref<512x512xf32, #tpu.memory_space<vmem>>, %arg5: memref<1x512xf32, #tpu.memory_space<vmem>>, %arg6: memref<512x512xf32, #tpu.memory_space<vmem>>, %arg7: memref<1x512xf32, #tpu.memory_space<vmem>>, %arg8: memref<512x128xf32, #tpu.memory_space<vmem>>, %arg9: memref<1x128xf32, #tpu.memory_space<vmem>>, %arg10: memref<8x128xf32, #tpu.memory_space<vmem>>) attributes {dimension_semantics = [#tpu.dimension_semantics<parallel>], iteration_bounds = array<i64: 1>, scalar_prefetch = 0 : i64, scratch_operands = 0 : i64, tpu.core_type = #tpu.core_type<tc>, window_params = [{transform_indices = @transform_0, window_bounds = array<i64: 8, 32>}, {pipeline_mode = #tpu.pipeline_mode<synchronous>, transform_indices = @transform_1, window_bounds = array<i64: 32, 512>}, {pipeline_mode = #tpu.pipeline_mode<synchronous>, transform_indices = @transform_2, window_bounds = array<i64: 1, 512>}, {pipeline_mode = #tpu.pipeline_mode<synchronous>, transform_indices = @transform_3, window_bounds = array<i64: 512, 512>}, {pipeline_mode = #tpu.pipeline_mode<synchronous>, transform_indices = @transform_4, window_bounds = array<i64: 1, 512>}, {pipeline_mode = #tpu.pipeline_mode<synchronous>, transform_indices = @transform_5, window_bounds = array<i64: 512, 512>}, {pipeline_mode = #tpu.pipeline_mode<synchronous>, transform_indices = @transform_6, window_bounds = array<i64: 1, 512>}, {pipeline_mode = #tpu.pipeline_mode<synchronous>, transform_indices = @transform_7, window_bounds = array<i64: 512, 128>}, {pipeline_mode = #tpu.pipeline_mode<synchronous>, transform_indices = @transform_8, window_bounds = array<i64: 1, 128>}, {transform_indices = @transform_9, window_bounds = array<i64: 8, 128>}]} {
    %c0 = arith.constant 0 : index
    %c0_0 = arith.constant 0 : index
    %0 = vector.load %arg1[%c0, %c0_0] : memref<8x32xf32, #tpu.memory_space<vmem>>, vector<8x32xf32>
    %c0_1 = arith.constant 0 : index
    %c0_2 = arith.constant 0 : index
    %1 = vector.load %arg2[%c0_1, %c0_2] : memref<32x512xf32, #tpu.memory_space<vmem>>, vector<32x512xf32>
    %cst = arith.constant dense<0.000000e+00> : vector<8x512xf32>
    %2 = tpu.matmul %0, %1, %cst {dimension_numbers = #tpu.dot_dimension_numbers<[1], [0], [0], [1], [0, 0, 1, 1], [], []>} : vector<8x32xf32>, vector<32x512xf32>, vector<8x512xf32> -> vector<8x512xf32>
    %c0_3 = arith.constant 0 : index
    %c0_4 = arith.constant 0 : index
    %3 = vector.load %arg3[%c0_3, %c0_4] : memref<1x512xf32, #tpu.memory_space<vmem>>, vector<1x512xf32>
    %4 = vector.broadcast %3 : vector<1x512xf32> to vector<8x512xf32>
    %5 = arith.addf %2, %4 : vector<8x512xf32>
    %cst_5 = arith.constant 0.000000e+00 : f32
    %6 = vector.broadcast %cst_5 : f32 to vector<8x512xf32>
    %7 = arith.maximumf %5, %6 : vector<8x512xf32>
    %c0_6 = arith.constant 0 : index
    %c0_7 = arith.constant 0 : index
    %8 = vector.load %arg4[%c0_6, %c0_7] : memref<512x512xf32, #tpu.memory_space<vmem>>, vector<512x512xf32>
    %cst_8 = arith.constant dense<0.000000e+00> : vector<8x512xf32>
    %9 = tpu.matmul %7, %8, %cst_8 {dimension_numbers = #tpu.dot_dimension_numbers<[1], [0], [0], [1], [0, 0, 1, 1], [], []>} : vector<8x512xf32>, vector<512x512xf32>, vector<8x512xf32> -> vector<8x512xf32>
    %c0_9 = arith.constant 0 : index
    %c0_10 = arith.constant 0 : index
    %10 = vector.load %arg5[%c0_9, %c0_10] : memref<1x512xf32, #tpu.memory_space<vmem>>, vector<1x512xf32>
    %11 = vector.broadcast %10 : vector<1x512xf32> to vector<8x512xf32>
    %12 = arith.addf %9, %11 : vector<8x512xf32>
    %cst_11 = arith.constant 0.000000e+00 : f32
    %13 = vector.broadcast %cst_11 : f32 to vector<8x512xf32>
    %14 = arith.maximumf %12, %13 : vector<8x512xf32>
    %c0_12 = arith.constant 0 : index
    %c0_13 = arith.constant 0 : index
    %15 = vector.load %arg6[%c0_12, %c0_13] : memref<512x512xf32, #tpu.memory_space<vmem>>, vector<512x512xf32>
    %cst_14 = arith.constant dense<0.000000e+00> : vector<8x512xf32>
    %16 = tpu.matmul %14, %15, %cst_14 {dimension_numbers = #tpu.dot_dimension_numbers<[1], [0], [0], [1], [0, 0, 1, 1], [], []>} : vector<8x512xf32>, vector<512x512xf32>, vector<8x512xf32> -> vector<8x512xf32>
    %c0_15 = arith.constant 0 : index
    %c0_16 = arith.constant 0 : index
    %17 = vector.load %arg7[%c0_15, %c0_16] : memref<1x512xf32, #tpu.memory_space<vmem>>, vector<1x512xf32>
    %18 = vector.broadcast %17 : vector<1x512xf32> to vector<8x512xf32>
    %19 = arith.addf %16, %18 : vector<8x512xf32>
    %cst_17 = arith.constant 0.000000e+00 : f32
    %20 = vector.broadcast %cst_17 : f32 to vector<8x512xf32>
    %21 = arith.maximumf %19, %20 : vector<8x512xf32>
    %c0_18 = arith.constant 0 : index
    %c0_19 = arith.constant 0 : index
    %22 = vector.load %arg8[%c0_18, %c0_19] : memref<512x128xf32, #tpu.memory_space<vmem>>, vector<512x128xf32>
    %cst_20 = arith.constant dense<0.000000e+00> : vector<8x128xf32>
    %23 = tpu.matmul %21, %22, %cst_20 {dimension_numbers = #tpu.dot_dimension_numbers<[1], [0], [0], [1], [0, 0, 1, 1], [], []>} : vector<8x512xf32>, vector<512x128xf32>, vector<8x128xf32> -> vector<8x128xf32>
    %c0_21 = arith.constant 0 : index
    %c0_22 = arith.constant 0 : index
    %24 = vector.load %arg9[%c0_21, %c0_22] : memref<1x128xf32, #tpu.memory_space<vmem>>, vector<1x128xf32>
    %25 = vector.broadcast %24 : vector<1x128xf32> to vector<8x128xf32>
    %26 = arith.addf %23, %25 : vector<8x128xf32>
    %c0_23 = arith.constant 0 : index
    %c0_24 = arith.constant 0 : index
    %27 = vector.load %arg10[%c0_23, %c0_24] : memref<8x128xf32, #tpu.memory_space<vmem>>, vector<8x128xf32>
    tpu.vector_store %arg10[%c0_23, %c0_24], %26 {strides = array<i32>} : memref<8x128xf32, #tpu.memory_space<vmem>>, vector<8x128xf32>,
    return
  }
  func.func @transform_0(%arg0: i32) -> (i32, i32) {
    %c0_i32 = arith.constant 0 : i32
    %c0_i32_0 = arith.constant 0 : i32
    return %arg0, %c0_i32 : i32, i32
  }
  func.func @transform_1(%arg0: i32) -> (i32, i32) {
    %c0_i32 = arith.constant 0 : i32
    %c0_i32_0 = arith.constant 0 : i32
    %c0_i32_1 = arith.constant 0 : i32
    return %c0_i32, %c0_i32_0 : i32, i32
  }
  func.func @transform_2(%arg0: i32) -> (i32, i32) {
    %c0_i32 = arith.constant 0 : i32
    %c0_i32_0 = arith.constant 0 : i32
    %c0_i32_1 = arith.constant 0 : i32
    return %c0_i32, %c0_i32_0 : i32, i32
  }
  func.func @transform_3(%arg0: i32) -> (i32, i32) {
    %c0_i32 = arith.constant 0 : i32
    %c0_i32_0 = arith.constant 0 : i32
    %c0_i32_1 = arith.constant 0 : i32
    return %c0_i32, %c0_i32_0 : i32, i32
  }
  func.func @transform_4(%arg0: i32) -> (i32, i32) {
    %c0_i32 = arith.constant 0 : i32
    %c0_i32_0 = arith.constant 0 : i32
    %c0_i32_1 = arith.constant 0 : i32
    return %c0_i32, %c0_i32_0 : i32, i32
  }
  func.func @transform_5(%arg0: i32) -> (i32, i32) {
    %c0_i32 = arith.constant 0 : i32
    %c0_i32_0 = arith.constant 0 : i32
    %c0_i32_1 = arith.constant 0 : i32
    return %c0_i32, %c0_i32_0 : i32, i32
  }
  func.func @transform_6(%arg0: i32) -> (i32, i32) {
    %c0_i32 = arith.constant 0 : i32
    %c0_i32_0 = arith.constant 0 : i32
    %c0_i32_1 = arith.constant 0 : i32
    return %c0_i32, %c0_i32_0 : i32, i32
  }
  func.func @transform_7(%arg0: i32) -> (i32, i32) {
    %c0_i32 = arith.constant 0 : i32
    %c0_i32_0 = arith.constant 0 : i32
    %c0_i32_1 = arith.constant 0 : i32
    return %c0_i32, %c0_i32_0 : i32, i32
  }
  func.func @transform_8(%arg0: i32) -> (i32, i32) {
    %c0_i32 = arith.constant 0 : i32
    %c0_i32_0 = arith.constant 0 : i32
    %c0_i32_1 = arith.constant 0 : i32
    return %c0_i32, %c0_i32_0 : i32, i32
  }
  func.func @transform_9(%arg0: i32) -> (i32, i32) {
    %c0_i32 = arith.constant 0 : i32
    %c0_i32_0 = arith.constant 0 : i32
    return %arg0, %c0_i32 : i32, i32
  }
}

</mosaic_0001>

<bundles_post_ra>
// kernel: tpu_custom_call.1
= control target key start
LH: loop header
LB: loop body
LE: loop exit
PB: predicated region body
PF: predicated region fallthrough
CT: control target
= control target key end

     0   :  { %14 = vsyncpa [#allocation3], 0  ;;  %s2681_s0 = inlined_call_operand.hbm [shape: f32[8,32], index: 0, kind: input, shape index: {}]   ;;  %s2682_s1 = inlined_call_operand.hbm [shape: f32[32,512], index: 1, kind: input, shape index: {}]   ;;  %s2683_s2 = inlined_call_operand.vmem [shape: f32[1,512], index: 2, kind: input, shape index: {}]   ;;  %s2684_s3 = inlined_call_operand.hbm [shape: f32[512,512], index: 3, kind: input, shape index: {}]   ;;  %s2685_s4 = inlined_call_operand.vmem [shape: f32[1,512], index: 4, kind: input, shape index: {}]   ;;  %s2686_s5 = inlined_call_operand.hbm [shape: f32[512,512], index: 5, kind: input, shape index: {}]   ;;  %s2687_s6 = inlined_call_operand.vmem [shape: f32[1,512], index: 6, kind: input, shape index: {}]   ;;  %s2688_s7 = inlined_call_operand.hbm [shape: f32[512,128], index: 7, kind: input, shape index: {}]   ;;  %s2689_s8 = inlined_call_operand.vmem [shape: f32[1,128], index: 8, kind: input, shape index: {}]   ;;  %s2690_s9 = inlined_call_operand.hbm [shape: f32[8,128], index: 9, kind: output, shape index: {}]  }
   0x1   :  { %15 = vsyncpa [#allocation6], 0 }
   0x2   :  { %16 = vsyncpa [#allocation9], 0 }
   0x3   :  { %17 = vsyncpa [#allocation4], 0  ;;  %s2481_s30 = smov [#allocation5]   ;;  %s2341_s13 = scalar_lea.hbm %s2682_s1, 2048 }
   0x4   :  { %s33_s10 = sshll.u32 %s2481_s30, 4  ;;  %p2342_p0 = scmp.ne.s32.totalorder %s2682_s1, %s2341_s13  ;;  %s34_s10 = int_to_ptr.vmem [resolvable:$true] %s33_s10 }
   0x5   :  { %p2345_p1 = scmp.lt.u32.totalorder %s2341_s13, %s2682_s1 }
   0x7   :  { %p2347_p2 = pnand %p2345_p1, %p2342_p0 }
   0x9   :  { %2350 = shalt.err (!%p2347_p2)
}
   0xa   :  { %s2351_s18 = scalar_lea.vmem %s34_s10, 2048  ;;  %p2356_p4 = scmp.lt.s32.totalorder %s34_s10, %s34_s10 }
   0xb   :  { %p2352_p3 = scmp.ne.s32.totalorder %s34_s10, %s2351_s18  ;;  %p2357_p5 = scmp.lt.s32.totalorder %s2351_s18, %s2351_s18 }
   0xd   :  { %p2358_p6 = por %p2357_p5, %p2356_p4 }
   0xf   :  { %p2359_p7 = pnand %p2358_p6, %p2352_p3 }
  0x11   :  { %2362 = shalt.err (!%p2359_p7)
}
  0x12   :  { %s2482_s19 = smov 512   ;;  %s2483_s20 = smov 32  }
  0x13   :  { %39 = dma.hbm_to_vmem [thread:$0]  %s2682_s1, 2048, %s34_s10, [#allocation6], %s2482_s19, %s2482_s19, %s2483_s20  }
  0x14   :  { %s2484_s23 = smov [#allocation8]   ;;  %s2485_s25 = smov [#allocation2]  }
  0x15   :  { %s61_s24 = sshll.u32 %s2484_s23, 4  ;;  %s24_s26 = sshll.u32 %s2485_s25, 4  ;;  %s62_s24 = int_to_ptr.vmem [resolvable:$true] %s61_s24  ;;  %s25_s26 = int_to_ptr.vmem [resolvable:$true] %s24_s26 }
  0x16   :  { %s2363_s29 = scalar_lea.hbm %s2686_s5, 32768 }
  0x17   :  { %p2364_p8 = scmp.ne.s32.totalorder %s2686_s5, %s2363_s29  ;;  %p2367_p9 = scmp.lt.u32.totalorder %s2363_s29, %s2686_s5 }
  0x19   :  { %p2369_p10 = pnand %p2367_p9, %p2364_p8 }
  0x1b   :  { %2372 = shalt.err (!%p2369_p10)
}
  0x1c   :  { %s2373_s1 = scalar_lea.vmem %s62_s24, 32768  ;;  %p2378_p12 = scmp.lt.s32.totalorder %s62_s24, %s62_s24 }
  0x1d   :  { %p2374_p11 = scmp.ne.s32.totalorder %s62_s24, %s2373_s1  ;;  %p2379_p13 = scmp.lt.s32.totalorder %s2373_s1, %s2373_s1 }
  0x1f   :  { %p2380_p0 = por %p2379_p13, %p2378_p12 }
  0x21   :  { %p2381_p1 = pnand %p2380_p0, %p2374_p11 }
  0x23   :  { %2384 = shalt.err (!%p2381_p1)
}
  0x24   :  { %67 = dma.hbm_to_vmem [thread:$0]  %s2686_s5, 32768, %s62_s24, [#allocation9], %s2482_s19, %s2482_s19, %s2483_s20  }
  0x25   :  { %s2385_s17 = scalar_lea.hbm %s2681_s0, 128 }
  0x26   :  { %p2386_p2 = scmp.ne.s32.totalorder %s2681_s0, %s2385_s17  ;;  %p2389_p3 = scmp.lt.u32.totalorder %s2385_s17, %s2681_s0 }
  0x28   :  { %p2391_p4 = pnand %p2389_p3, %p2386_p2 }
  0x2a   :  { %2394 = shalt.err (!%p2391_p4)
}
  0x2b   :  { %s2395_s25 = scalar_lea.vmem %s25_s26, 128  ;;  %p2400_p6 = scmp.lt.s32.totalorder %s25_s26, %s25_s26 }
  0x2c   :  { %p2396_p5 = scmp.ne.s32.totalorder %s25_s26, %s2395_s25  ;;  %p2401_p7 = scmp.lt.s32.totalorder %s2395_s25, %s2395_s25 }
  0x2e   :  { %p2402_p8 = por %p2401_p7, %p2400_p6 }
  0x30   :  { %p2403_p9 = pnand %p2402_p8, %p2396_p5 }
  0x32   :  { %2406 = shalt.err (!%p2403_p9)
}
  0x33   :  { %27 = dma.hbm_to_vmem [thread:$0]  %s2681_s0, 128, %s25_s26, [#allocation3]  }
  0x34   :  { %s2486_s27 = smov [#allocation7]   ;;  %s2487_s29 = smov [#allocation10]  }
  0x35   :  { %s47_s28 = sshll.u32 %s2486_s27, 4  ;;  %s75_s30 = sshll.u32 %s2487_s29, 4  ;;  %s48_s28 = int_to_ptr.vmem [resolvable:$true] %s47_s28  ;;  %s76_s30 = int_to_ptr.vmem [resolvable:$true] %s75_s30 }
  0x36   :  { %s2407_s13 = scalar_lea.hbm %s2684_s3, 32768 }
  0x37   :  { %p2408_p10 = scmp.ne.s32.totalorder %s2684_s3, %s2407_s13  ;;  %p2411_p11 = scmp.lt.u32.totalorder %s2407_s13, %s2684_s3 }
  0x39   :  { %p2413_p12 = pnand %p2411_p11, %p2408_p10 }
  0x3b   :  { %2416 = shalt.err (!%p2413_p12)
}
  0x3c   :  { %s2417_s0 = scalar_lea.vmem %s48_s28, 32768  ;;  %p2422_p0 = scmp.lt.s32.totalorder %s48_s28, %s48_s28 }
  0x3d   :  { %p2418_p13 = scmp.ne.s32.totalorder %s48_s28, %s2417_s0  ;;  %p2423_p1 = scmp.lt.s32.totalorder %s2417_s0, %s2417_s0 }
  0x3f   :  { %p2424_p2 = por %p2423_p1, %p2422_p0 }
  0x41   :  { %p2425_p3 = pnand %p2424_p2, %p2418_p13 }
  0x43   :  { %2428 = shalt.err (!%p2425_p3)
}
  0x44   :  { %53 = dma.hbm_to_vmem [thread:$0]  %s2684_s3, 32768, %s48_s28, [#allocation6], %s2482_s19, %s2482_s19, %s2483_s20  }
  0x45   :  { %s2429_s21 = scalar_lea.hbm %s2688_s7, 8192 }
  0x46   :  { %p2430_p4 = scmp.ne.s32.totalorder %s2688_s7, %s2429_s21  ;;  %p2433_p5 = scmp.lt.u32.totalorder %s2429_s21, %s2688_s7 }
  0x48   :  { %p2435_p6 = pnand %p2433_p5, %p2430_p4 }
  0x4a   :  { %2438 = shalt.err (!%p2435_p6)
}
  0x4b   :  { %s2439_s24 = scalar_lea.vmem %s76_s30, 8192  ;;  %p2444_p8 = scmp.lt.s32.totalorder %s76_s30, %s76_s30 }
  0x4c   :  { %p2440_p7 = scmp.ne.s32.totalorder %s76_s30, %s2439_s24  ;;  %p2445_p9 = scmp.lt.s32.totalorder %s2439_s24, %s2439_s24 }
  0x4e   :  { %p2446_p10 = por %p2445_p9, %p2444_p8 }
  0x50   :  { %p2447_p11 = pnand %p2446_p10, %p2440_p7 }
  0x52   :  { %2450 = shalt.err (!%p2447_p11)
}
  0x53   :  { %s2488_s3 = smov 128   ;;  %s2489_s19 = smov 8  }
  0x54   :  { %81 = dma.hbm_to_vmem [thread:$0]  %s2688_s7, 8192, %s76_s30, [#allocation9], %s2488_s3, %s2488_s3, %s2489_s19  }
  0x55   :  { %2473 = dma.done.wait [#allocation3], 128  }
  0x56   :  { %2474 = vsyncadd [#allocation3], 4294967168 }
  0x57   :  { %2475 = dma.done.wait [#allocation6], 34816  }
  0x58   :  { %2476 = vsyncadd [#allocation6], 4294932480 }
  0x59   :  { %2477 = dma.done.wait [#allocation9], 40960  }
  0x5a   :  { %2478 = vsyncadd [#allocation9], 4294926336  ;;  %v2490_v0 = vmov 0.0   ;;  %v101_v1 = vld [vmem:[#allocation5 + $0x8] sm:$0xff]  ;;  %v100_v3 = vld [vmem:[#allocation5] sm:$0xff]  ;;  %vm138_vm0 = vcmask 261120  }
  0x5b   :  { %206 = vmatprep.mubr.f32.mxu0 %v2490_v0  ;;  %277 = vmatprep.mubr.f32.mxu1 %v2490_v0  ;;  %v105_v2 = vld [vmem:[#allocation5 + $0x28] sm:$0xff]  ;;  %v104_v5 = vld [vmem:[#allocation5 + $0x20] sm:$0xff]  ;;  %v103_v12 = vld [vmem:[#allocation5 + $0x18] sm:$0xff]  ;;  %s2491_s12 = smov [#allocation11]  }
  0x5c   :  { %v1722_v4 = vpack.c.bf16 %v105_v2, %v101_v1  ;;  %v109_v6 = vld [vmem:[#allocation5 + $0x48] sm:$0xff]  ;;  %v1724_v8 = vpack.c.bf16 %v104_v5, %v100_v3  ;;  %v108_v10 = vld [vmem:[#allocation5 + $0x40] sm:$0xff]  ;;  %v107_v13 = vld [vmem:[#allocation5 + $0x38] sm:$0xff]  ;;  %s1638_s13 = sshll.u32 %s2491_s12, 4  ;;  %s1639_s13 = int_to_ptr.vmem [resolvable:$true] %s1638_s13 }
  0x5d   :  { %v113_v7 = vld [vmem:[#allocation5 + $0x68] sm:$0xff]  ;;  %v112_v11 = vld [vmem:[#allocation5 + $0x60] sm:$0xff]  ;;  %v102_v14 = vld [vmem:[#allocation5 + $0x10] sm:$0xff]  ;;  %v1730_v16 = vpack.c.bf16 %v107_v13, %v103_v12  ;;  %s2451_s1 = scalar_lea.vmem %s1639_s13, 128  ;;  %p2456_p13 = scmp.lt.s32.totalorder %s1639_s13, %s1639_s13 }
  0x5e   :  { %v1726_v9 = vpack.c.bf16 %v113_v7, %v109_v6  ;;  %1723 = vmatprep.subr.bf16.mxu0 %v1722_v4  ;;  %v1728_v15 = vpack.c.bf16 %v112_v11, %v108_v10  ;;  %v106_v17 = vld [vmem:[#allocation5 + $0x30] sm:$0xff]  ;;  %v111_v18 = vld [vmem:[#allocation5 + $0x58] sm:$0xff]  ;;  %v289_v24 = vld [vmem:[#allocation7 + $0x8] sm:$0xff]  ;;  %p2452_p12 = scmp.ne.s32.totalorder %s1639_s13, %s2451_s1  ;;  %p2457_p0 = scmp.lt.s32.totalorder %s2451_s1, %s2451_s1 }
  0x5f   :  { %1725 = vmatpush1.bf16.msra.mxu0 %v1724_v8  ;;  %v115_v19 = vld [vmem:[#allocation5 + $0x78] sm:$0xff]  ;;  %v1732_v20 = vpack.c.bf16 %v106_v17, %v102_v14  ;;  %v110_v22 = vld [vmem:[#allocation5 + $0x50] sm:$0xff]  ;;  %1731 = vmatprep.subr.bf16.mxu1 %v1730_v16  ;;  %v293_v26 = vld [vmem:[#allocation7 + $0x28] sm:$0xff] }
  0x60   :  { %1727 = vmatprep.subr.bf16.mxu0 %v1726_v9  ;;  %v1734_v21 = vpack.c.bf16 %v115_v19, %v111_v18  ;;  %v114_v23 = vld [vmem:[#allocation5 + $0x70] sm:$0xff]  ;;  %v99_v25 = vld [vmem:[#allocation2] sm:$0xff]  ;;  %v1738_v30 = vpack.c.bf16 %v293_v26, %v289_v24  ;;  %v288_v31 = vld [vmem:[#allocation7] sm:$0xff]  ;;  %p2458_p1 = por %p2457_p0, %p2456_p13 }
  0x61   :  { %v291_v27 = vld [vmem:[#allocation7 + $0x18] sm:$0xff]  ;;  %1733 = vmatpush1.bf16.msra.mxu1 %v1732_v20  ;;  %v1736_v29 = vpack.c.bf16 %v114_v23, %v110_v22  ;;  %v292_v32 = vld [vmem:[#allocation7 + $0x20] sm:$0xff]  ;;  %v290_v33 = vld [vmem:[#allocation7 + $0x10] sm:$0xff] }
  0x62   :  { %v295_v28 = vld [vmem:[#allocation7 + $0x38] sm:$0xff]  ;;  %1735 = vmatprep.subr.bf16.mxu1 %v1734_v21  ;;  %v1740_v35 = vpack.c.bf16 %v292_v32, %v288_v31  ;;  %v294_v36 = vld [vmem:[#allocation7 + $0x30] sm:$0xff]  ;;  %v297_v37 = vld [vmem:[#allocation7 + $0x48] sm:$0xff]  ;;  %p2459_p2 = pnand %p2458_p1, %p2452_p12 }
  0x63   :  { %1729 = vmatpush1.bf16.msra.mxu0 %v1728_v15  ;;  %v1866_v34 = vpack.c.bf16 %v295_v28, %v291_v27  ;;  %v301_v38 = vld [vmem:[#allocation7 + $0x68] sm:$0xff]  ;;  %v299_v40 = vld [vmem:[#allocation7 + $0x58] sm:$0xff]  ;;  %v296_v42 = vld [vmem:[#allocation7 + $0x40] sm:$0xff]  ;;  %v1868_v44 = vpack.c.bf16 %v294_v36, %v290_v33 }
  0x64   :  { %1739 = vmatprep.subr.bf16.mxu0 %v1738_v30  ;;  %v1742_v39 = vpack.c.bf16 %v301_v38, %v297_v37  ;;  %v303_v41 = vld [vmem:[#allocation7 + $0x78] sm:$0xff]  ;;  %v300_v43 = vld [vmem:[#allocation7 + $0x60] sm:$0xff]  ;;  %v305_v45 = vld [vmem:[#allocation7 + $0x88] sm:$0xff] }
  0x65   :  { %1737 = vmatpush1.bf16.msra.mxu1 %v1736_v29  ;;  %v309_v46 = vld [vmem:[#allocation7 + $0xa8] sm:$0xff]  ;;  %v1870_v47 = vpack.c.bf16 %v303_v41, %v299_v40  ;;  %v1744_v48 = vpack.c.bf16 %v300_v43, %v296_v42  ;;  %v298_v49 = vld [vmem:[#allocation7 + $0x50] sm:$0xff]  ;;  %v307_v51 = vld [vmem:[#allocation7 + $0x98] sm:$0xff] }
  0x66   :  { %1649 = vmatmul.mubr.msk.f32.vlgmr.msra.gmra.mrb[0].mxu0 %vm138_vm0, %v99_v25  ;;  %1867 = vmatprep.subr.bf16.mxu1 %v1866_v34  ;;  %v302_v50 = vld [vmem:[#allocation7 + $0x70] sm:$0xff]  ;;  %v1746_v52 = vpack.c.bf16 %v309_v46, %v305_v45  ;;  %v311_v53 = vld [vmem:[#allocation7 + $0xb8] sm:$0xff]  ;;  %v304_v54 = vld [vmem:[#allocation7 + $0x80] sm:$0xff] }
  0x67   :  { %1741 = vmatpush1.bf16.msra.mxu0 %v1740_v35  ;;  %v308_v55 = vld [vmem:[#allocation7 + $0xa0] sm:$0xff]  ;;  %v313_v56 = vld [vmem:[#allocation7 + $0xc8] sm:$0xff]  ;;  %v1872_v58 = vpack.c.bf16 %v302_v50, %v298_v49  ;;  %v1874_v59 = vpack.c.bf16 %v311_v53, %v307_v51  ;;  %v306_v61 = vld [vmem:[#allocation7 + $0x90] sm:$0xff] }
  0x68   :  { %1743 = vmatprep.subr.bf16.mxu0 %v1742_v39  ;;  %1650 = vmatmul.mubr.msk.f32.vlgmr.msra.gmra.mrb[0].mxu1 %vm138_vm0, %v99_v25  ;;  %v317_v57 = vld [vmem:[#allocation7 + $0xe8] sm:$0xff]  ;;  %v1748_v60 = vpack.c.bf16 %v308_v55, %v304_v54  ;;  %v310_v62 = vld [vmem:[#allocation7 + $0xb0] sm:$0xff]  ;;  %v315_v63 = vld [vmem:[#allocation7 + $0xd8] sm:$0xff] }
  0x69   :  { %1869 = vmatpush1.bf16.msra.mxu1 %v1868_v44  ;;  %v1750_v0 = vpack.c.bf16 %v317_v57, %v313_v56  ;;  %v319_v1 = vld [vmem:[#allocation7 + $0xf8] sm:$0xff]  ;;  %v312_v2 = vld [vmem:[#allocation7 + $0xc0] sm:$0xff]  ;;  %v321_v4 = vld [vmem:[#allocation7 + $0x108] sm:$0xff]  ;;  %v1876_v6 = vpack.c.bf16 %v310_v62, %v306_v61 }
  0x6a   :  { %1871 = vmatprep.subr.bf16.mxu1 %v1870_v47  ;;  %v316_v3 = vld [vmem:[#allocation7 + $0xe0] sm:$0xff]  ;;  %v325_v5 = vld [vmem:[#allocation7 + $0x128] sm:$0xff]  ;;  %v1878_v7 = vpack.c.bf16 %v319_v1, %v315_v63  ;;  %v314_v9 = vld [vmem:[#allocation7 + $0xd0] sm:$0xff] }
  0x6b   :  { %1745 = vmatpush1.bf16.msra.mxu0 %v1744_v48  ;;  %v1752_v8 = vpack.c.bf16 %v316_v3, %v312_v2  ;;  %v318_v10 = vld [vmem:[#allocation7 + $0xf0] sm:$0xff]  ;;  %v323_v11 = vld [vmem:[#allocation7 + $0x118] sm:$0xff]  ;;  %v1754_v12 = vpack.c.bf16 %v325_v5, %v321_v4  ;;  %v320_v14 = vld [vmem:[#allocation7 + $0x100] sm:$0xff] }
  0x6c   :  { %1747 = vmatprep.subr.bf16.mxu0 %v1746_v52  ;;  %v327_v13 = vld [vmem:[#allocation7 + $0x138] sm:$0xff]  ;;  %v324_v15 = vld [vmem:[#allocation7 + $0x120] sm:$0xff]  ;;  %v329_v16 = vld [vmem:[#allocation7 + $0x148] sm:$0xff]  ;;  %v1880_v18 = vpack.c.bf16 %v318_v10, %v314_v9 }
  0x6d   :  { %1873 = vmatpush1.bf16.msra.mxu1 %v1872_v58  ;;  %v333_v17 = vld [vmem:[#allocation7 + $0x168] sm:$0xff]  ;;  %v1882_v19 = vpack.c.bf16 %v327_v13, %v323_v11  ;;  %v1756_v20 = vpack.c.bf16 %v324_v15, %v320_v14  ;;  %v322_v21 = vld [vmem:[#allocation7 + $0x110] sm:$0xff]  ;;  %v331_v23 = vld [vmem:[#allocation7 + $0x158] sm:$0xff] }
  0x6e   :  { %1875 = vmatprep.subr.bf16.mxu1 %v1874_v59  ;;  %v326_v22 = vld [vmem:[#allocation7 + $0x130] sm:$0xff]  ;;  %v1758_v24 = vpack.c.bf16 %v333_v17, %v329_v16  ;;  %v335_v25 = vld [vmem:[#allocation7 + $0x178] sm:$0xff]  ;;  %v328_v26 = vld [vmem:[#allocation7 + $0x140] sm:$0xff] }
  0x6f   :  { %1749 = vmatpush1.bf16.msra.mxu0 %v1748_v60  ;;  %v332_v27 = vld [vmem:[#allocation7 + $0x160] sm:$0xff]  ;;  %v337_v28 = vld [vmem:[#allocation7 + $0x188] sm:$0xff]  ;;  %v1884_v30 = vpack.c.bf16 %v326_v22, %v322_v21  ;;  %v1886_v31 = vpack.c.bf16 %v335_v25, %v331_v23  ;;  %v330_v33 = vld [vmem:[#allocation7 + $0x150] sm:$0xff] }
  0x70   :  { %1751 = vmatprep.subr.bf16.mxu0 %v1750_v0  ;;  %v341_v29 = vld [vmem:[#allocation7 + $0x1a8] sm:$0xff]  ;;  %v1760_v32 = vpack.c.bf16 %v332_v27, %v328_v26  ;;  %v334_v34 = vld [vmem:[#allocation7 + $0x170] sm:$0xff]  ;;  %v339_v35 = vld [vmem:[#allocation7 + $0x198] sm:$0xff] }
  0x71   :  { %1877 = vmatpush1.bf16.msra.mxu1 %v1876_v6  ;;  %v1762_v36 = vpack.c.bf16 %v341_v29, %v337_v28  ;;  %v343_v37 = vld [vmem:[#allocation7 + $0x1b8] sm:$0xff]  ;;  %v336_v38 = vld [vmem:[#allocation7 + $0x180] sm:$0xff]  ;;  %v345_v40 = vld [vmem:[#allocation7 + $0x1c8] sm:$0xff]  ;;  %v1888_v42 = vpack.c.bf16 %v334_v34, %v330_v33 }
  0x72   :  { %1879 = vmatprep.subr.bf16.mxu1 %v1878_v7  ;;  %v340_v39 = vld [vmem:[#allocation7 + $0x1a0] sm:$0xff]  ;;  %v349_v41 = vld [vmem:[#allocation7 + $0x1e8] sm:$0xff]  ;;  %v1890_v43 = vpack.c.bf16 %v343_v37, %v339_v35  ;;  %v338_v45 = vld [vmem:[#allocation7 + $0x190] sm:$0xff] }
  0x73   :  { %1753 = vmatpush1.bf16.msra.mxu0 %v1752_v8  ;;  %v1764_v44 = vpack.c.bf16 %v340_v39, %v336_v38  ;;  %v342_v46 = vld [vmem:[#allocation7 + $0x1b0] sm:$0xff]  ;;  %v347_v47 = vld [vmem:[#allocation7 + $0x1d8] sm:$0xff]  ;;  %v1766_v48 = vpack.c.bf16 %v349_v41, %v345_v40  ;;  %v344_v50 = vld [vmem:[#allocation7 + $0x1c0] sm:$0xff] }
  0x74   :  { %1755 = vmatprep.subr.bf16.mxu0 %v1754_v12  ;;  %v351_v49 = vld [vmem:[#allocation7 + $0x1f8] sm:$0xff]  ;;  %v348_v51 = vld [vmem:[#allocation7 + $0x1e0] sm:$0xff]  ;;  %v353_v52 = vld [vmem:[#allocation7 + $0x208] sm:$0xff]  ;;  %v1892_v54 = vpack.c.bf16 %v342_v46, %v338_v45 }
  0x75   :  { %1881 = vmatpush1.bf16.msra.mxu1 %v1880_v18  ;;  %v357_v53 = vld [vmem:[#allocation7 + $0x228] sm:$0xff]  ;;  %v1894_v55 = vpack.c.bf16 %v351_v49, %v347_v47  ;;  %v1768_v56 = vpack.c.bf16 %v348_v51, %v344_v50  ;;  %v346_v57 = vld [vmem:[#allocation7 + $0x1d0] sm:$0xff]  ;;  %v355_v59 = vld [vmem:[#allocation7 + $0x218] sm:$0xff] }
  0x76   :  { %1883 = vmatprep.subr.bf16.mxu1 %v1882_v19  ;;  %v350_v58 = vld [vmem:[#allocation7 + $0x1f0] sm:$0xff]  ;;  %v1770_v60 = vpack.c.bf16 %v357_v53, %v353_v52  ;;  %v359_v61 = vld [vmem:[#allocation7 + $0x238] sm:$0xff]  ;;  %v352_v62 = vld [vmem:[#allocation7 + $0x200] sm:$0xff] }
  0x77   :  { %1757 = vmatpush1.bf16.msra.mxu0 %v1756_v20  ;;  %v356_v63 = vld [vmem:[#allocation7 + $0x220] sm:$0xff]  ;;  %v361_v0 = vld [vmem:[#allocation7 + $0x248] sm:$0xff]  ;;  %v1896_v2 = vpack.c.bf16 %v350_v58, %v346_v57  ;;  %v1898_v3 = vpack.c.bf16 %v359_v61, %v355_v59  ;;  %v354_v5 = vld [vmem:[#allocation7 + $0x210] sm:$0xff] }
  0x78   :  { %1759 = vmatprep.subr.bf16.mxu0 %v1758_v24  ;;  %v365_v1 = vld [vmem:[#allocation7 + $0x268] sm:$0xff]  ;;  %v1772_v4 = vpack.c.bf16 %v356_v63, %v352_v62  ;;  %v358_v6 = vld [vmem:[#allocation7 + $0x230] sm:$0xff]  ;;  %v363_v7 = vld [vmem:[#allocation7 + $0x258] sm:$0xff] }
  0x79   :  { %1885 = vmatpush1.bf16.msra.mxu1 %v1884_v30  ;;  %v1774_v8 = vpack.c.bf16 %v365_v1, %v361_v0  ;;  %v367_v9 = vld [vmem:[#allocation7 + $0x278] sm:$0xff]  ;;  %v360_v10 = vld [vmem:[#allocation7 + $0x240] sm:$0xff]  ;;  %v369_v12 = vld [vmem:[#allocation7 + $0x288] sm:$0xff]  ;;  %v1900_v14 = vpack.c.bf16 %v358_v6, %v354_v5 }
  0x7a   :  { %1887 = vmatprep.subr.bf16.mxu1 %v1886_v31  ;;  %v364_v11 = vld [vmem:[#allocation7 + $0x260] sm:$0xff]  ;;  %v373_v13 = vld [vmem:[#allocation7 + $0x2a8] sm:$0xff]  ;;  %v1902_v15 = vpack.c.bf16 %v367_v9, %v363_v7  ;;  %v362_v17 = vld [vmem:[#allocation7 + $0x250] sm:$0xff] }
  0x7b   :  { %1761 = vmatpush1.bf16.msra.mxu0 %v1760_v32  ;;  %v1776_v16 = vpack.c.bf16 %v364_v11, %v360_v10  ;;  %v366_v18 = vld [vmem:[#allocation7 + $0x270] sm:$0xff]  ;;  %v371_v19 = vld [vmem:[#allocation7 + $0x298] sm:$0xff]  ;;  %v1778_v20 = vpack.c.bf16 %v373_v13, %v369_v12  ;;  %v368_v22 = vld [vmem:[#allocation7 + $0x280] sm:$0xff] }
  0x7c   :  { %1763 = vmatprep.subr.bf16.mxu0 %v1762_v36  ;;  %v375_v21 = vld [vmem:[#allocation7 + $0x2b8] sm:$0xff]  ;;  %v372_v23 = vld [vmem:[#allocation7 + $0x2a0] sm:$0xff]  ;;  %v377_v24 = vld [vmem:[#allocation7 + $0x2c8] sm:$0xff]  ;;  %v1904_v26 = vpack.c.bf16 %v366_v18, %v362_v17 }
  0x7d   :  { %1889 = vmatpush1.bf16.msra.mxu1 %v1888_v42  ;;  %v381_v25 = vld [vmem:[#allocation7 + $0x2e8] sm:$0xff]  ;;  %v1906_v27 = vpack.c.bf16 %v375_v21, %v371_v19  ;;  %v1780_v28 = vpack.c.bf16 %v372_v23, %v368_v22  ;;  %v370_v29 = vld [vmem:[#allocation7 + $0x290] sm:$0xff]  ;;  %v379_v31 = vld [vmem:[#allocation7 + $0x2d8] sm:$0xff] }
  0x7e   :  { %1891 = vmatprep.subr.bf16.mxu1 %v1890_v43  ;;  %v374_v30 = vld [vmem:[#allocation7 + $0x2b0] sm:$0xff]  ;;  %v1782_v32 = vpack.c.bf16 %v381_v25, %v377_v24  ;;  %v383_v33 = vld [vmem:[#allocation7 + $0x2f8] sm:$0xff]  ;;  %v376_v34 = vld [vmem:[#allocation7 + $0x2c0] sm:$0xff] }
  0x7f   :  { %1765 = vmatpush1.bf16.msra.mxu0 %v1764_v44  ;;  %v380_v35 = vld [vmem:[#allocation7 + $0x2e0] sm:$0xff]  ;;  %v385_v36 = vld [vmem:[#allocation7 + $0x308] sm:$0xff]  ;;  %v1908_v38 = vpack.c.bf16 %v374_v30, %v370_v29  ;;  %v1910_v39 = vpack.c.bf16 %v383_v33, %v379_v31  ;;  %v378_v41 = vld [vmem:[#allocation7 + $0x2d0] sm:$0xff] }
  0x80   :  { %1767 = vmatprep.subr.bf16.mxu0 %v1766_v48  ;;  %v389_v37 = vld [vmem:[#allocation7 + $0x328] sm:$0xff]  ;;  %v1784_v40 = vpack.c.bf16 %v380_v35, %v376_v34  ;;  %v382_v42 = vld [vmem:[#allocation7 + $0x2f0] sm:$0xff]  ;;  %v387_v43 = vld [vmem:[#allocation7 + $0x318] sm:$0xff] }
  0x81   :  { %1893 = vmatpush1.bf16.msra.mxu1 %v1892_v54  ;;  %v1786_v44 = vpack.c.bf16 %v389_v37, %v385_v36  ;;  %v391_v45 = vld [vmem:[#allocation7 + $0x338] sm:$0xff]  ;;  %v384_v46 = vld [vmem:[#allocation7 + $0x300] sm:$0xff]  ;;  %v393_v48 = vld [vmem:[#allocation7 + $0x348] sm:$0xff]  ;;  %v1912_v50 = vpack.c.bf16 %v382_v42, %v378_v41 }
  0x82   :  { %1895 = vmatprep.subr.bf16.mxu1 %v1894_v55  ;;  %v388_v47 = vld [vmem:[#allocation7 + $0x320] sm:$0xff]  ;;  %v397_v49 = vld [vmem:[#allocation7 + $0x368] sm:$0xff]  ;;  %v1914_v51 = vpack.c.bf16 %v391_v45, %v387_v43  ;;  %v386_v53 = vld [vmem:[#allocation7 + $0x310] sm:$0xff] }
  0x83   :  { %1769 = vmatpush1.bf16.msra.mxu0 %v1768_v56  ;;  %v1788_v52 = vpack.c.bf16 %v388_v47, %v384_v46  ;;  %v390_v54 = vld [vmem:[#allocation7 + $0x330] sm:$0xff]  ;;  %v395_v55 = vld [vmem:[#allocation7 + $0x358] sm:$0xff]  ;;  %v1790_v56 = vpack.c.bf16 %v397_v49, %v393_v48  ;;  %v392_v58 = vld [vmem:[#allocation7 + $0x340] sm:$0xff] }
  0x84   :  { %1771 = vmatprep.subr.bf16.mxu0 %v1770_v60  ;;  %v399_v57 = vld [vmem:[#allocation7 + $0x378] sm:$0xff]  ;;  %v396_v59 = vld [vmem:[#allocation7 + $0x360] sm:$0xff]  ;;  %v401_v60 = vld [vmem:[#allocation7 + $0x388] sm:$0xff]  ;;  %v1916_v62 = vpack.c.bf16 %v390_v54, %v386_v53 }
  0x85   :  { %1897 = vmatpush1.bf16.msra.mxu1 %v1896_v2  ;;  %v405_v61 = vld [vmem:[#allocation7 + $0x3a8] sm:$0xff]  ;;  %v1918_v63 = vpack.c.bf16 %v399_v57, %v395_v55  ;;  %v1792_v0 = vpack.c.bf16 %v396_v59, %v392_v58  ;;  %v394_v1 = vld [vmem:[#allocation7 + $0x350] sm:$0xff]  ;;  %v407_v5 = vld [vmem:[#allocation7 + $0x3b8] sm:$0xff] }
  0x86   :  { %1899 = vmatprep.subr.bf16.mxu1 %v1898_v3  ;;  %v398_v2 = vld [vmem:[#allocation7 + $0x370] sm:$0xff]  ;;  %v403_v3 = vld [vmem:[#allocation7 + $0x398] sm:$0xff]  ;;  %v400_v6 = vld [vmem:[#allocation7 + $0x380] sm:$0xff] }
  0x87   :  { %1773 = vmatpush1.bf16.msra.mxu0 %v1772_v4  ;;  %v1794_v4 = vpack.c.bf16 %v405_v61, %v401_v60  ;;  %v404_v7 = vld [vmem:[#allocation7 + $0x3a0] sm:$0xff]  ;;  %v1922_v9 = vpack.c.bf16 %v407_v5, %v403_v3  ;;  %v402_v11 = vld [vmem:[#allocation7 + $0x390] sm:$0xff]  ;;  %v415_v18 = vld [vmem:[#allocation7 + $0x3f8] sm:$0xff] }
  0x88   :  { %1775 = vmatprep.subr.bf16.mxu0 %v1774_v8  ;;  %v1920_v8 = vpack.c.bf16 %v398_v2, %v394_v1  ;;  %v1796_v10 = vpack.c.bf16 %v404_v7, %v400_v6  ;;  %v406_v12 = vld [vmem:[#allocation7 + $0x3b0] sm:$0xff]  ;;  %v408_v19 = vld [vmem:[#allocation7 + $0x3c0] sm:$0xff]  ;;  %v423_v30 = vld [vmem:[#allocation7 + $0x438] sm:$0xff] }
  0x89   :  { %1901 = vmatpush1.bf16.msra.mxu1 %v1900_v14  ;;  %v1924_v13 = vpack.c.bf16 %v406_v12, %v402_v11  ;;  %v409_v14 = vld [vmem:[#allocation7 + $0x3c8] sm:$0xff]  ;;  %v410_v23 = vld [vmem:[#allocation7 + $0x3d0] sm:$0xff]  ;;  %v2621_v35 = vld [vmem:[%s2683_s2] sm:$0xf] }
  0x8a   :  { %1903 = vmatprep.subr.bf16.mxu1 %v1902_v15  ;;  %v413_v15 = vld [vmem:[#allocation7 + $0x3e8] sm:$0xff]  ;;  %v414_v24 = vld [vmem:[#allocation7 + $0x3f0] sm:$0xff]  ;;  %v416_v41 = vld [vmem:[#allocation7 + $0x400] sm:$0xff] }
  0x8b   :  { %1777 = vmatpush1.bf16.msra.mxu0 %v1776_v16  ;;  %v411_v16 = vld [vmem:[#allocation7 + $0x3d8] sm:$0xff]  ;;  %v1798_v17 = vpack.c.bf16 %v413_v15, %v409_v14  ;;  %v1928_v25 = vpack.c.bf16 %v414_v24, %v410_v23  ;;  %v420_v42 = vld [vmem:[#allocation7 + $0x420] sm:$0xff]  ;;  %v418_v45 = vld [vmem:[#allocation7 + $0x410] sm:$0xff] }
  0x8c   :  { %1779 = vmatprep.subr.bf16.mxu0 %v1778_v20  ;;  %v412_v20 = vld [vmem:[#allocation7 + $0x3e0] sm:$0xff]  ;;  %v1926_v21 = vpack.c.bf16 %v415_v18, %v411_v16  ;;  %v422_v46 = vld [vmem:[#allocation7 + $0x430] sm:$0xff]  ;;  %v425_v47 = vld [vmem:[#allocation7 + $0x448] sm:$0xff]  ;;  %v1804_v55 = vpack.c.bf16 %v420_v42, %v416_v41 }
  0x8d   :  { %1905 = vmatpush1.bf16.msra.mxu1 %v1904_v26  ;;  %v1800_v22 = vpack.c.bf16 %v412_v20, %v408_v19  ;;  %v417_v26 = vld [vmem:[#allocation7 + $0x408] sm:$0xff]  ;;  %v424_v57 = vld [vmem:[#allocation7 + $0x440] sm:$0xff]  ;;  %v439_v5 = vld [vmem:[#allocation7 + $0x4b8] sm:$0xff] }
  0x8e   :  { %1907 = vmatprep.subr.bf16.mxu1 %v1906_v27  ;;  %v421_v27 = vld [vmem:[#allocation7 + $0x428] sm:$0xff]  ;;  %v428_v58 = vld [vmem:[#allocation7 + $0x460] sm:$0xff]  ;;  %v438_v14 = vld [vmem:[#allocation7 + $0x4b0] sm:$0xff] }
  0x8f   :  { %1781 = vmatpush1.bf16.msra.mxu0 %v1780_v28  ;;  %v419_v28 = vld [vmem:[#allocation7 + $0x418] sm:$0xff]  ;;  %v1802_v29 = vpack.c.bf16 %v421_v27, %v417_v26  ;;  %v433_v1 = vld [vmem:[#allocation7 + $0x488] sm:$0xff]  ;;  %v1808_v7 = vpack.c.bf16 %v428_v58, %v424_v57  ;;  %v446_v26 = vld [vmem:[#allocation7 + $0x4f0] sm:$0xff] }
  0x90   :  { %1783 = vmatprep.subr.bf16.mxu0 %v1782_v32  ;;  %v1930_v31 = vpack.c.bf16 %v423_v30, %v419_v28  ;;  %v118_v32 = vlaneseq  ;;  %v437_v3 = vld [vmem:[#allocation7 + $0x4a8] sm:$0xff]  ;;  %v447_v18 = vld [vmem:[#allocation7 + $0x4f8] sm:$0xff]  ;;  %v450_v42 = vld [vmem:[#allocation7 + $0x510] sm:$0xff] }
  0x91   :  { %1909 = vmatpush1.bf16.msra.mxu1 %v1908_v38  ;;  %v1810_v11 = vpack.c.bf16 %v437_v3, %v433_v1  ;;  %v441_v15 = vld [vmem:[#allocation7 + $0x4c8] sm:$0xff]  ;;  %v455_v30 = vld [vmem:[#allocation7 + $0x538] sm:$0xff]  ;;  %v466_v3 = vld [vmem:[#allocation7 + $0x590] sm:$0xff] }
  0x92   :  { %1911 = vmatprep.subr.bf16.mxu1 %v1910_v39  ;;  %v2613_v33 = vshrl.u32 %v118_v32, 7  ;;  %v445_v16 = vld [vmem:[#allocation7 + $0x4e8] sm:$0xff] }
  0x93   :  { %1785 = vmatpush1.bf16.msra.mxu0 %v1784_v40  ;;  %v1814_v23 = vpack.c.bf16 %v445_v16, %v441_v15  ;;  %v449_v27 = vld [vmem:[#allocation7 + $0x508] sm:$0xff]  ;;  %v474_v15 = vld [vmem:[#allocation7 + $0x5d0] sm:$0xff] }
  0x94   :  { %1787 = vmatprep.subr.bf16.mxu0 %v1786_v44  ;;  %v2616_v34 = vsub.s32 0, %v2613_v33  ;;  %v2624_v36 = vsub.s32 1, %v2613_v33  ;;  %v2629_v38 = vsub.s32 3, %v2613_v33  ;;  %v453_v28 = vld [vmem:[#allocation7 + $0x528] sm:$0xff]  ;;  %v478_v16 = vld [vmem:[#allocation7 + $0x5f0] sm:$0xff] }
  0x95   :  { %1913 = vmatpush1.bf16.msra.mxu1 %v1912_v50  ;;  %v429_v50 = vld [vmem:[#allocation7 + $0x468] sm:$0xff] }
  0x96   :  { %1915 = vmatprep.subr.bf16.mxu1 %v1914_v51  ;;  %v121_v37 = vrot.slane %v2621_v35, %v2616_v34  ;;  %v125_v39 = vrot.slane %v2621_v35, %v2624_v36  ;;  %v133_v48 = vrot.slane %v2621_v35, %v2629_v38  ;;  %v427_v51 = vld [vmem:[#allocation7 + $0x458] sm:$0xff]  ;;  %v1806_v61 = vpack.c.bf16 %v429_v50, %v425_v47  ;;  %v456_v50 = vld [vmem:[#allocation7 + $0x540] sm:$0xff]  ;;  %v465_v57 = vld [vmem:[#allocation7 + $0x588] sm:$0xff] }
  0x97   :  { %1789 = vmatpush1.bf16.msra.mxu0 %v1788_v52  ;;  %v431_v52 = vld [vmem:[#allocation7 + $0x478] sm:$0xff]  ;;  %v469_v58 = vld [vmem:[#allocation7 + $0x5a8] sm:$0xff] }
  0x98   :  { %1791 = vmatprep.subr.bf16.mxu0 %v1790_v56  ;;  %v1932_v56 = vpack.c.bf16 %v422_v46, %v418_v45  ;;  %v461_v45 = vld [vmem:[#allocation7 + $0x568] sm:$0xff]  ;;  %v459_v46 = vld [vmem:[#allocation7 + $0x558] sm:$0xff]  ;;  %v1826_v1 = vpack.c.bf16 %v469_v58, %v465_v57  ;;  %v498_v57 = vld [vmem:[#allocation7 + $0x690] sm:$0xff] }
  0x99   :  { %1917 = vmatpush1.bf16.msra.mxu1 %v1916_v62  ;;  %v1934_v62 = vpack.c.bf16 %v431_v52, %v427_v51  ;;  %v463_v47 = vld [vmem:[#allocation7 + $0x578] sm:$0xff]  ;;  %v460_v51 = vld [vmem:[#allocation7 + $0x560] sm:$0xff]  ;;  %v502_v58 = vld [vmem:[#allocation7 + $0x6b0] sm:$0xff] }
  0x9a   :  { %1919 = vmatprep.subr.bf16.mxu1 %v1918_v63  ;;  %v426_v63 = vld [vmem:[#allocation7 + $0x450] sm:$0xff] }
  0x9b   :  { %1793 = vmatpush1.bf16.msra.mxu0 %v1792_v0  ;;  %v430_v0 = vld [vmem:[#allocation7 + $0x470] sm:$0xff] }
  0x9c   :  { %1795 = vmatprep.subr.bf16.mxu0 %v1794_v4  ;;  %v435_v4 = vld [vmem:[#allocation7 + $0x498] sm:$0xff] }
  0x9d   :  { %1921 = vmatpush1.bf16.msra.mxu1 %v1920_v8  ;;  %v1936_v8 = vpack.c.bf16 %v430_v0, %v426_v63  ;;  %v1938_v12 = vpack.c.bf16 %v439_v5, %v435_v4  ;;  %v464_v63 = vld [vmem:[#allocation7 + $0x580] sm:$0xff]  ;;  %v470_v4 = vld [vmem:[#allocation7 + $0x5b0] sm:$0xff]  ;;  %v473_v5 = vld [vmem:[#allocation7 + $0x5c8] sm:$0xff] }
  0x9e   :  { %1923 = vmatprep.subr.bf16.mxu1 %v1922_v9  ;;  %v432_v9 = vld [vmem:[#allocation7 + $0x480] sm:$0xff] }
  0x9f   :  { %1797 = vmatpush1.bf16.msra.mxu0 %v1796_v10  ;;  %v436_v10 = vld [vmem:[#allocation7 + $0x4a0] sm:$0xff] }
  0xa0   :  { %1799 = vmatprep.subr.bf16.mxu0 %v1798_v17  ;;  %v443_v17 = vld [vmem:[#allocation7 + $0x4d8] sm:$0xff]  ;;  %v1812_v19 = vpack.c.bf16 %v436_v10, %v432_v9  ;;  %v468_v0 = vld [vmem:[#allocation7 + $0x5a0] sm:$0xff]  ;;  %v1956_v10 = vpack.c.bf16 %v470_v4, %v466_v3 }
  0xa1   :  { %1925 = vmatpush1.bf16.msra.mxu1 %v1924_v13  ;;  %v434_v13 = vld [vmem:[#allocation7 + $0x490] sm:$0xff]  ;;  %v1942_v24 = vpack.c.bf16 %v447_v18, %v443_v17  ;;  %v1828_v9 = vpack.c.bf16 %v468_v0, %v464_v63  ;;  %v481_v17 = vld [vmem:[#allocation7 + $0x608] sm:$0xff]  ;;  %v1972_v0 = vpack.c.bf16 %v502_v58, %v498_v57  ;;  %v540_v57 = vld [vmem:[#allocation7 + $0x7e0] sm:$0xff] }
  0xa2   :  { %1927 = vmatprep.subr.bf16.mxu1 %v1926_v21  ;;  %v1940_v20 = vpack.c.bf16 %v438_v14, %v434_v13  ;;  %v440_v21 = vld [vmem:[#allocation7 + $0x4c0] sm:$0xff]  ;;  %v485_v18 = vld [vmem:[#allocation7 + $0x628] sm:$0xff] }
  0xa3   :  { %1801 = vmatpush1.bf16.msra.mxu0 %v1800_v22  ;;  %v444_v22 = vld [vmem:[#allocation7 + $0x4e0] sm:$0xff] }
  0xa4   :  { %1803 = vmatprep.subr.bf16.mxu0 %v1802_v29  ;;  %v451_v29 = vld [vmem:[#allocation7 + $0x518] sm:$0xff] }
  0xa5   :  { %1929 = vmatpush1.bf16.msra.mxu1 %v1928_v25  ;;  %v442_v25 = vld [vmem:[#allocation7 + $0x4d0] sm:$0xff]  ;;  %v1946_v41 = vpack.c.bf16 %v455_v30, %v451_v29  ;;  %v489_v29 = vld [vmem:[#allocation7 + $0x648] sm:$0xff] }
  0xa6   :  { %1931 = vmatprep.subr.bf16.mxu1 %v1930_v31  ;;  %v1816_v31 = vpack.c.bf16 %v444_v22, %v440_v21  ;;  %v1944_v32 = vpack.c.bf16 %v446_v26, %v442_v25  ;;  %v1960_v22 = vpack.c.bf16 %v478_v16, %v474_v15  ;;  %v1834_v25 = vpack.c.bf16 %v485_v18, %v481_v17  ;;  %v493_v30 = vld [vmem:[#allocation7 + $0x668] sm:$0xff]  ;;  %v514_v17 = vld [vmem:[#allocation7 + $0x710] sm:$0xff] }
  0xa7   :  { %v518_v18 = vld [vmem:[#allocation7 + $0x730] sm:$0xff] }
 0x139   :  { %v208_v40 = vpop.f32.mrb[0].mxu0 }
 0x13a   :  { %v209_v43 = vadd.f32 %v208_v40, %v121_v37  ;;  %v210_v44 = vpop.f32.mrb[1].mxu0  ;;  %v448_v37 = vld [vmem:[#allocation7 + $0x500] sm:$0xff]  ;;  %v1818_v40 = vpack.c.bf16 %v453_v28, %v449_v27  ;;  %v482_v27 = vld [vmem:[#allocation7 + $0x610] sm:$0xff] }
 0x13b   :  { %v211_v49 = vadd.f32 %v210_v44, %v125_v39  ;;  %v2635_v53 = vpop.f32.mrb[0].mxu1  ;;  %v452_v39 = vld [vmem:[#allocation7 + $0x520] sm:$0xff]  ;;  %v457_v44 = vld [vmem:[#allocation7 + $0x548] sm:$0xff]  ;;  %v486_v28 = vld [vmem:[#allocation7 + $0x630] sm:$0xff] }
 0x13c   :  { %v281_v59 = vpop.f32.mrb[1].mxu1  ;;  %v284_v60 = vmax.f32 %v209_v43, 0.0  ;;  %v454_v43 = vld [vmem:[#allocation7 + $0x530] sm:$0xff]  ;;  %v1822_v52 = vpack.c.bf16 %v461_v45, %v457_v44 }
 0x13d   :  { %v285_v54 = vmax.f32 %v211_v49, 0.0  ;;  %v282_v2 = vadd.f32 %v281_v59, %v133_v48  ;;  %v1820_v48 = vpack.c.bf16 %v452_v39, %v448_v37  ;;  %v1948_v49 = vpack.c.bf16 %v454_v43, %v450_v42  ;;  %v467_v59 = vld [vmem:[#allocation7 + $0x598] sm:$0xff]  ;;  %v490_v44 = vld [vmem:[#allocation7 + $0x650] sm:$0xff] }
 0x13e   :  { %v1964_v39 = vpack.c.bf16 %v486_v28, %v482_v27  ;;  %v1838_v42 = vpack.c.bf16 %v493_v30, %v489_v29  ;;  %v494_v45 = vld [vmem:[#allocation7 + $0x670] sm:$0xff] }
 0x13f   :  { %630 = vmatprep.mubr.f32.mxu0 %v285_v54  ;;  %772 = vmatprep.mubr.f32.mxu1 %v285_v54  ;;  %v287_v6 = vmax.f32 %v282_v2, 0.0  ;;  %v1950_v54 = vpack.c.bf16 %v463_v47, %v459_v46  ;;  %v497_v46 = vld [vmem:[#allocation7 + $0x688] sm:$0xff]  ;;  %v522_v29 = vld [vmem:[#allocation7 + $0x750] sm:$0xff] }
 0x140   :  { %631 = vmatmul.mubr.f32.vlgmr.msra.gmra.mrb[2].mxu0 %v284_v60  ;;  %773 = vmatmul.mubr.f32.vlgmr.msra.gmra.mrb[2].mxu1 %v284_v60  ;;  %v471_v60 = vld [vmem:[#allocation7 + $0x5b8] sm:$0xff]  ;;  %v501_v47 = vld [vmem:[#allocation7 + $0x6a8] sm:$0xff]  ;;  %v526_v30 = vld [vmem:[#allocation7 + $0x770] sm:$0xff] }
 0x141   :  { %1805 = vmatpush1.bf16.msra.mxu0 %v1804_v55  ;;  %1933 = vmatpush1.bf16.msra.mxu1 %v1932_v56  ;;  %v458_v55 = vld [vmem:[#allocation7 + $0x550] sm:$0xff]  ;;  %v1954_v2 = vpack.c.bf16 %v471_v60, %v467_v59  ;;  %v505_v59 = vld [vmem:[#allocation7 + $0x6c8] sm:$0xff] }
 0x142   :  { %1807 = vmatprep.subr.bf16.mxu0 %v1806_v61  ;;  %1935 = vmatprep.subr.bf16.mxu1 %v1934_v62  ;;  %v462_v56 = vld [vmem:[#allocation7 + $0x570] sm:$0xff]  ;;  %v1824_v61 = vpack.c.bf16 %v460_v51, %v456_v50  ;;  %v1968_v51 = vpack.c.bf16 %v494_v45, %v490_v44  ;;  %v509_v60 = vld [vmem:[#allocation7 + $0x6e8] sm:$0xff]  ;;  %v2638_v44 = vsub.s32 2, %v2613_v33 }
 0x143   :  { %701 = vmatprep.mubr.f32.mxu0 %v287_v6  ;;  %843 = vmatprep.mubr.f32.mxu1 %v287_v6  ;;  %v1952_v62 = vpack.c.bf16 %v462_v56, %v458_v55  ;;  %v477_v6 = vld [vmem:[#allocation7 + $0x5e8] sm:$0xff]  ;;  %v1842_v55 = vpack.c.bf16 %v501_v47, %v497_v46  ;;  %v1846_v3 = vpack.c.bf16 %v509_v60, %v505_v59  ;;  %v530_v47 = vld [vmem:[#allocation7 + $0x790] sm:$0xff] }
 0x144   :  { %v1830_v13 = vpack.c.bf16 %v477_v6, %v473_v5  ;;  %v506_v5 = vld [vmem:[#allocation7 + $0x6d0] sm:$0xff]  ;;  %v129_v58 = vrot.slane %v2621_v35, %v2638_v44 }
 0x145   :  { %1809 = vmatpush1.bf16.msra.mxu0 %v1808_v7  ;;  %1937 = vmatpush1.bf16.msra.mxu1 %v1936_v8  ;;  %v475_v7 = vld [vmem:[#allocation7 + $0x5d8] sm:$0xff]  ;;  %v510_v6 = vld [vmem:[#allocation7 + $0x6f0] sm:$0xff] }
 0x146   :  { %1811 = vmatprep.subr.bf16.mxu0 %v1810_v11  ;;  %1939 = vmatprep.subr.bf16.mxu1 %v1938_v12  ;;  %v479_v8 = vld [vmem:[#allocation7 + $0x5f8] sm:$0xff]  ;;  %v472_v11 = vld [vmem:[#allocation7 + $0x5c0] sm:$0xff]  ;;  %v538_v60 = vld [vmem:[#allocation7 + $0x7d0] sm:$0xff] }
 0x147   :  { %v476_v12 = vld [vmem:[#allocation7 + $0x5e0] sm:$0xff]  ;;  %v1958_v14 = vpack.c.bf16 %v479_v8, %v475_v7  ;;  %v513_v7 = vld [vmem:[#allocation7 + $0x708] sm:$0xff] }
 0x148   :  { %v1832_v21 = vpack.c.bf16 %v476_v12, %v472_v11  ;;  %v517_v8 = vld [vmem:[#allocation7 + $0x728] sm:$0xff]  ;;  %v1976_v12 = vpack.c.bf16 %v510_v6, %v506_v5  ;;  %v858_v5 = vld [vmem:[#allocation8 + $0x20] sm:$0xff]  ;;  %v280_v6 = vadd.f32 %v2635_v53, %v129_v58 }
 0x149   :  { %1813 = vmatpush1.bf16.msra.mxu0 %v1812_v19  ;;  %1941 = vmatpush1.bf16.msra.mxu1 %v1940_v20  ;;  %v483_v19 = vld [vmem:[#allocation7 + $0x618] sm:$0xff]  ;;  %v1850_v15 = vpack.c.bf16 %v517_v8, %v513_v7  ;;  %v856_v8 = vld [vmem:[#allocation8 + $0x10] sm:$0xff] }
 0x14a   :  { %1815 = vmatprep.subr.bf16.mxu0 %v1814_v23  ;;  %1943 = vmatprep.subr.bf16.mxu1 %v1942_v24  ;;  %v487_v20 = vld [vmem:[#allocation7 + $0x638] sm:$0xff]  ;;  %v480_v23 = vld [vmem:[#allocation7 + $0x600] sm:$0xff] }
 0x14b   :  { %v484_v24 = vld [vmem:[#allocation7 + $0x620] sm:$0xff]  ;;  %v1962_v26 = vpack.c.bf16 %v487_v20, %v483_v19  ;;  %v521_v19 = vld [vmem:[#allocation7 + $0x748] sm:$0xff] }
 0x14c   :  { %v1836_v37 = vpack.c.bf16 %v484_v24, %v480_v23  ;;  %v525_v20 = vld [vmem:[#allocation7 + $0x768] sm:$0xff]  ;;  %v1980_v24 = vpack.c.bf16 %v518_v18, %v514_v17  ;;  %v866_v17 = vld [vmem:[#allocation8 + $0x60] sm:$0xff]  ;;  %v286_v18 = vmax.f32 %v280_v6, 0.0 }
 0x14d   :  { %1817 = vmatpush1.bf16.msra.mxu0 %v1816_v31  ;;  %1945 = vmatpush1.bf16.msra.mxu1 %v1944_v32  ;;  %v491_v31 = vld [vmem:[#allocation7 + $0x658] sm:$0xff]  ;;  %v1854_v27 = vpack.c.bf16 %v525_v20, %v521_v19  ;;  %v864_v20 = vld [vmem:[#allocation8 + $0x50] sm:$0xff]  ;;  %v894_v6 = vld [vmem:[#allocation8 + $0x140] sm:$0xff] }
 0x14e   :  { %1819 = vmatprep.subr.bf16.mxu0 %v1818_v40  ;;  %1947 = vmatprep.subr.bf16.mxu1 %v1946_v41  ;;  %v495_v32 = vld [vmem:[#allocation7 + $0x678] sm:$0xff]  ;;  %v488_v40 = vld [vmem:[#allocation7 + $0x640] sm:$0xff] }
 0x14f   :  { %v492_v41 = vld [vmem:[#allocation7 + $0x660] sm:$0xff]  ;;  %v1966_v43 = vpack.c.bf16 %v495_v32, %v491_v31  ;;  %v529_v31 = vld [vmem:[#allocation7 + $0x788] sm:$0xff] }
 0x150   :  { %v1840_v50 = vpack.c.bf16 %v492_v41, %v488_v40  ;;  %v533_v32 = vld [vmem:[#allocation7 + $0x7a8] sm:$0xff]  ;;  %v1984_v41 = vpack.c.bf16 %v526_v30, %v522_v29  ;;  %v874_v29 = vld [vmem:[#allocation8 + $0xa0] sm:$0xff] }
 0x151   :  { %1821 = vmatpush1.bf16.msra.mxu0 %v1820_v48  ;;  %1949 = vmatpush1.bf16.msra.mxu1 %v1948_v49  ;;  %v499_v48 = vld [vmem:[#allocation7 + $0x698] sm:$0xff]  ;;  %v1858_v45 = vpack.c.bf16 %v533_v32, %v529_v31  ;;  %v872_v32 = vld [vmem:[#allocation8 + $0x90] sm:$0xff] }
 0x152   :  { %1823 = vmatprep.subr.bf16.mxu0 %v1822_v52  ;;  %1951 = vmatprep.subr.bf16.mxu1 %v1950_v54  ;;  %v503_v49 = vld [vmem:[#allocation7 + $0x6b8] sm:$0xff]  ;;  %v496_v52 = vld [vmem:[#allocation7 + $0x680] sm:$0xff] }
 0x153   :  { %v500_v54 = vld [vmem:[#allocation7 + $0x6a0] sm:$0xff]  ;;  %v1970_v56 = vpack.c.bf16 %v503_v49, %v499_v48  ;;  %v534_v48 = vld [vmem:[#allocation7 + $0x7b0] sm:$0xff]  ;;  %v537_v49 = vld [vmem:[#allocation7 + $0x7c8] sm:$0xff] }
 0x154   :  { %v1844_v63 = vpack.c.bf16 %v500_v54, %v496_v52  ;;  %v543_v52 = vld [vmem:[#allocation7 + $0x7f8] sm:$0xff] }
 0x155   :  { %1825 = vmatpush1.bf16.msra.mxu0 %v1824_v61  ;;  %1953 = vmatpush1.bf16.msra.mxu1 %v1952_v62  ;;  %v507_v61 = vld [vmem:[#allocation7 + $0x6d8] sm:$0xff] }
 0x156   :  { %1827 = vmatprep.subr.bf16.mxu0 %v1826_v1  ;;  %1955 = vmatprep.subr.bf16.mxu1 %v1954_v2  ;;  %v511_v62 = vld [vmem:[#allocation7 + $0x6f8] sm:$0xff]  ;;  %v504_v1 = vld [vmem:[#allocation7 + $0x6c0] sm:$0xff] }
 0x157   :  { %v508_v2 = vld [vmem:[#allocation7 + $0x6e0] sm:$0xff]  ;;  %v1974_v4 = vpack.c.bf16 %v511_v62, %v507_v61  ;;  %v542_v61 = vld [vmem:[#allocation7 + $0x7f0] sm:$0xff]  ;;  %v855_v62 = vld [vmem:[#allocation8 + $0x8] sm:$0xff] }
 0x158   :  { %v1848_v11 = vpack.c.bf16 %v508_v2, %v504_v1  ;;  %v861_v1 = vld [vmem:[#allocation8 + $0x38] sm:$0xff] }
 0x159   :  { %1829 = vmatpush1.bf16.msra.mxu0 %v1828_v9  ;;  %1957 = vmatpush1.bf16.msra.mxu1 %v1956_v10  ;;  %v515_v9 = vld [vmem:[#allocation7 + $0x718] sm:$0xff] }
 0x15a   :  { %1831 = vmatprep.subr.bf16.mxu0 %v1830_v13  ;;  %1959 = vmatprep.subr.bf16.mxu1 %v1958_v14  ;;  %v519_v10 = vld [vmem:[#allocation7 + $0x738] sm:$0xff]  ;;  %v512_v13 = vld [vmem:[#allocation7 + $0x700] sm:$0xff] }
 0x15b   :  { %v516_v14 = vld [vmem:[#allocation7 + $0x720] sm:$0xff]  ;;  %v1978_v16 = vpack.c.bf16 %v519_v10, %v515_v9  ;;  %v860_v9 = vld [vmem:[#allocation8 + $0x30] sm:$0xff]  ;;  %v863_v10 = vld [vmem:[#allocation8 + $0x48] sm:$0xff] }
 0x15c   :  { %v1852_v23 = vpack.c.bf16 %v516_v14, %v512_v13  ;;  %v869_v13 = vld [vmem:[#allocation8 + $0x78] sm:$0xff] }
 0x15d   :  { %1833 = vmatpush1.bf16.msra.mxu0 %v1832_v21  ;;  %1961 = vmatpush1.bf16.msra.mxu1 %v1960_v22  ;;  %v523_v21 = vld [vmem:[#allocation7 + $0x758] sm:$0xff] }
 0x15e   :  { %1835 = vmatprep.subr.bf16.mxu0 %v1834_v25  ;;  %1963 = vmatprep.subr.bf16.mxu1 %v1962_v26  ;;  %v527_v22 = vld [vmem:[#allocation7 + $0x778] sm:$0xff]  ;;  %v520_v25 = vld [vmem:[#allocation7 + $0x740] sm:$0xff] }
 0x15f   :  { %v524_v26 = vld [vmem:[#allocation7 + $0x760] sm:$0xff]  ;;  %v1982_v28 = vpack.c.bf16 %v527_v22, %v523_v21  ;;  %v868_v21 = vld [vmem:[#allocation8 + $0x70] sm:$0xff]  ;;  %v871_v22 = vld [vmem:[#allocation8 + $0x88] sm:$0xff] }
 0x160   :  { %v1856_v40 = vpack.c.bf16 %v524_v26, %v520_v25  ;;  %v877_v25 = vld [vmem:[#allocation8 + $0xb8] sm:$0xff] }
 0x161   :  { %1837 = vmatpush1.bf16.msra.mxu0 %v1836_v37  ;;  %1965 = vmatpush1.bf16.msra.mxu1 %v1964_v39  ;;  %v531_v37 = vld [vmem:[#allocation7 + $0x798] sm:$0xff] }
 0x162   :  { %1839 = vmatprep.subr.bf16.mxu0 %v1838_v42  ;;  %1967 = vmatprep.subr.bf16.mxu1 %v1966_v43  ;;  %v535_v39 = vld [vmem:[#allocation7 + $0x7b8] sm:$0xff]  ;;  %v528_v42 = vld [vmem:[#allocation7 + $0x780] sm:$0xff] }
 0x163   :  { %v532_v43 = vld [vmem:[#allocation7 + $0x7a0] sm:$0xff]  ;;  %v1986_v46 = vpack.c.bf16 %v535_v39, %v531_v37  ;;  %v876_v37 = vld [vmem:[#allocation8 + $0xb0] sm:$0xff]  ;;  %v879_v39 = vld [vmem:[#allocation8 + $0xc8] sm:$0xff] }
 0x164   :  { %v1860_v54 = vpack.c.bf16 %v532_v43, %v528_v42  ;;  %v885_v42 = vld [vmem:[#allocation8 + $0xf8] sm:$0xff] }
 0x165   :  { %1841 = vmatpush1.bf16.msra.mxu0 %v1840_v50  ;;  %1969 = vmatpush1.bf16.msra.mxu1 %v1968_v51  ;;  %v541_v50 = vld [vmem:[#allocation7 + $0x7e8] sm:$0xff]  ;;  %v539_v51 = vld [vmem:[#allocation7 + $0x7d8] sm:$0xff] }
 0x166   :  { %1843 = vmatprep.subr.bf16.mxu0 %v1842_v55  ;;  %1971 = vmatprep.subr.bf16.mxu1 %v1970_v56  ;;  %v1988_v55 = vpack.c.bf16 %v534_v48, %v530_v47  ;;  %v536_v56 = vld [vmem:[#allocation7 + $0x7c0] sm:$0xff]  ;;  %v1862_v33 = vpack.c.bf16 %v541_v50, %v537_v49  ;;  %v1990_v59 = vpack.c.bf16 %v543_v52, %v539_v51  ;;  %v880_v50 = vld [vmem:[#allocation8 + $0xd0] sm:$0xff]  ;;  %v887_v52 = vld [vmem:[#allocation8 + $0x108] sm:$0xff] }
 0x167   :  { %v1864_v2 = vpack.c.bf16 %v540_v57, %v536_v56  ;;  %v882_v47 = vld [vmem:[#allocation8 + $0xe0] sm:$0xff]  ;;  %v884_v51 = vld [vmem:[#allocation8 + $0xf0] sm:$0xff]  ;;  %v893_v56 = vld [vmem:[#allocation8 + $0x138] sm:$0xff] }
 0x168   :  { %v2136_v58 = vpack.c.bf16 %v884_v51, %v880_v50  ;;  %v920_v50 = vld [vmem:[#allocation8 + $0x210] sm:$0xff] }
 0x169   :  { %1845 = vmatpush1.bf16.msra.mxu0 %v1844_v63  ;;  %1973 = vmatpush1.bf16.msra.mxu1 %v1972_v0  ;;  %v859_v63 = vld [vmem:[#allocation8 + $0x28] sm:$0xff]  ;;  %v857_v0 = vld [vmem:[#allocation8 + $0x18] sm:$0xff]  ;;  %v924_v51 = vld [vmem:[#allocation8 + $0x230] sm:$0xff] }
 0x16a   :  { %1847 = vmatprep.subr.bf16.mxu0 %v1846_v3  ;;  %1975 = vmatprep.subr.bf16.mxu1 %v1974_v4  ;;  %v1992_v3 = vpack.c.bf16 %v542_v61, %v538_v60  ;;  %v854_v4 = vld [vmem:[#allocation8] sm:$0xff]  ;;  %v1994_v35 = vpack.c.bf16 %v859_v63, %v855_v62  ;;  %v2122_v7 = vpack.c.bf16 %v861_v1, %v857_v0  ;;  %v888_v62 = vld [vmem:[#allocation8 + $0x110] sm:$0xff]  ;;  %v895_v0 = vld [vmem:[#allocation8 + $0x148] sm:$0xff] }
 0x16b   :  { %v1996_v14 = vpack.c.bf16 %v858_v5, %v854_v4  ;;  %v892_v63 = vld [vmem:[#allocation8 + $0x130] sm:$0xff]  ;;  %v899_v1 = vld [vmem:[#allocation8 + $0x168] sm:$0xff] }
 0x16c   :  { %v2140_v5 = vpack.c.bf16 %v892_v63, %v888_v62  ;;  %v928_v62 = vld [vmem:[#allocation8 + $0x250] sm:$0xff] }
 0x16d   :  { %1849 = vmatpush1.bf16.msra.mxu0 %v1848_v11  ;;  %1977 = vmatpush1.bf16.msra.mxu1 %v1976_v12  ;;  %v867_v11 = vld [vmem:[#allocation8 + $0x68] sm:$0xff]  ;;  %v865_v12 = vld [vmem:[#allocation8 + $0x58] sm:$0xff]  ;;  %v932_v63 = vld [vmem:[#allocation8 + $0x270] sm:$0xff] }
 0x16e   :  { %1851 = vmatprep.subr.bf16.mxu0 %v1850_v15  ;;  %1979 = vmatprep.subr.bf16.mxu1 %v1978_v16  ;;  %v2124_v15 = vpack.c.bf16 %v860_v9, %v856_v8  ;;  %v862_v16 = vld [vmem:[#allocation8 + $0x40] sm:$0xff]  ;;  %v1998_v53 = vpack.c.bf16 %v867_v11, %v863_v10  ;;  %v2126_v19 = vpack.c.bf16 %v869_v13, %v865_v12  ;;  %v896_v9 = vld [vmem:[#allocation8 + $0x150] sm:$0xff]  ;;  %v903_v11 = vld [vmem:[#allocation8 + $0x188] sm:$0xff] }
 0x16f   :  { %v2000_v26 = vpack.c.bf16 %v866_v17, %v862_v16  ;;  %v900_v10 = vld [vmem:[#allocation8 + $0x170] sm:$0xff]  ;;  %v907_v12 = vld [vmem:[#allocation8 + $0x1a8] sm:$0xff]  ;;  %v905_v13 = vld [vmem:[#allocation8 + $0x198] sm:$0xff] }
 0x170   :  { %v2144_v16 = vpack.c.bf16 %v900_v10, %v896_v9  ;;  %v902_v17 = vld [vmem:[#allocation8 + $0x180] sm:$0xff]  ;;  %v936_v9 = vld [vmem:[#allocation8 + $0x290] sm:$0xff] }
 0x171   :  { %1853 = vmatpush1.bf16.msra.mxu0 %v1852_v23  ;;  %1981 = vmatpush1.bf16.msra.mxu1 %v1980_v24  ;;  %v875_v23 = vld [vmem:[#allocation8 + $0xa8] sm:$0xff]  ;;  %v873_v24 = vld [vmem:[#allocation8 + $0x98] sm:$0xff]  ;;  %v940_v10 = vld [vmem:[#allocation8 + $0x2b0] sm:$0xff] }
 0x172   :  { %1855 = vmatprep.subr.bf16.mxu0 %v1854_v27  ;;  %1983 = vmatprep.subr.bf16.mxu1 %v1982_v28  ;;  %v2128_v27 = vpack.c.bf16 %v868_v21, %v864_v20  ;;  %v870_v28 = vld [vmem:[#allocation8 + $0x80] sm:$0xff]  ;;  %v2002_v30 = vpack.c.bf16 %v875_v23, %v871_v22  ;;  %v2130_v31 = vpack.c.bf16 %v877_v25, %v873_v24  ;;  %v904_v20 = vld [vmem:[#allocation8 + $0x190] sm:$0xff]  ;;  %v911_v22 = vld [vmem:[#allocation8 + $0x1c8] sm:$0xff] }
 0x173   :  { %v2004_v43 = vpack.c.bf16 %v874_v29, %v870_v28  ;;  %v908_v21 = vld [vmem:[#allocation8 + $0x1b0] sm:$0xff]  ;;  %v915_v23 = vld [vmem:[#allocation8 + $0x1e8] sm:$0xff]  ;;  %v913_v24 = vld [vmem:[#allocation8 + $0x1d8] sm:$0xff] }
 0x174   :  { %v917_v25 = vld [vmem:[#allocation8 + $0x1f8] sm:$0xff]  ;;  %v910_v28 = vld [vmem:[#allocation8 + $0x1c0] sm:$0xff] }
 0x175   :  { %1857 = vmatpush1.bf16.msra.mxu0 %v1856_v40  ;;  %1985 = vmatpush1.bf16.msra.mxu1 %v1984_v41  ;;  %v883_v40 = vld [vmem:[#allocation8 + $0xe8] sm:$0xff]  ;;  %v881_v41 = vld [vmem:[#allocation8 + $0xd8] sm:$0xff]  ;;  %v914_v29 = vld [vmem:[#allocation8 + $0x1e0] sm:$0xff] }
 0x176   :  { %1859 = vmatprep.subr.bf16.mxu0 %v1858_v45  ;;  %1987 = vmatprep.subr.bf16.mxu1 %v1986_v46  ;;  %v2132_v45 = vpack.c.bf16 %v876_v37, %v872_v32  ;;  %v878_v46 = vld [vmem:[#allocation8 + $0xc0] sm:$0xff]  ;;  %v2006_v48 = vpack.c.bf16 %v883_v40, %v879_v39  ;;  %v2134_v49 = vpack.c.bf16 %v885_v42, %v881_v41  ;;  %v912_v32 = vld [vmem:[#allocation8 + $0x1d0] sm:$0xff]  ;;  %v919_v39 = vld [vmem:[#allocation8 + $0x208] sm:$0xff] }
 0x177   :  { %v2008_v57 = vpack.c.bf16 %v882_v47, %v878_v46  ;;  %v916_v37 = vld [vmem:[#allocation8 + $0x1f0] sm:$0xff]  ;;  %v923_v40 = vld [vmem:[#allocation8 + $0x228] sm:$0xff]  ;;  %v921_v41 = vld [vmem:[#allocation8 + $0x218] sm:$0xff] }
 0x178   :  { %v925_v42 = vld [vmem:[#allocation8 + $0x238] sm:$0xff]  ;;  %v918_v46 = vld [vmem:[#allocation8 + $0x200] sm:$0xff] }
 0x179   :  { %1861 = vmatpush1.bf16.msra.mxu0 %v1860_v54  ;;  %1989 = vmatpush1.bf16.msra.mxu1 %v1988_v55  ;;  %v891_v54 = vld [vmem:[#allocation8 + $0x128] sm:$0xff]  ;;  %v889_v55 = vld [vmem:[#allocation8 + $0x118] sm:$0xff]  ;;  %v922_v47 = vld [vmem:[#allocation8 + $0x220] sm:$0xff] }
 0x17a   :  { %1863 = vmatprep.subr.bf16.mxu0 %v1862_v33  ;;  %1991 = vmatprep.subr.bf16.mxu1 %v1990_v59  ;;  %v886_v33 = vld [vmem:[#allocation8 + $0x100] sm:$0xff]  ;;  %v2010_v60 = vpack.c.bf16 %v891_v54, %v887_v52  ;;  %v2138_v61 = vpack.c.bf16 %v893_v56, %v889_v55  ;;  %v927_v52 = vld [vmem:[#allocation8 + $0x248] sm:$0xff]  ;;  %v929_v55 = vld [vmem:[#allocation8 + $0x258] sm:$0xff] }
 0x17b   :  { %v890_v59 = vld [vmem:[#allocation8 + $0x120] sm:$0xff]  ;;  %v931_v54 = vld [vmem:[#allocation8 + $0x268] sm:$0xff]  ;;  %v933_v56 = vld [vmem:[#allocation8 + $0x278] sm:$0xff] }
 0x17c   :  { %v2012_v4 = vpack.c.bf16 %v890_v59, %v886_v33  ;;  %v926_v33 = vld [vmem:[#allocation8 + $0x240] sm:$0xff] }
 0x17d   :  { %1865 = vmatpush1.bf16.msra.mxu0 %v1864_v2  ;;  %1993 = vmatpush1.bf16.msra.mxu1 %v1992_v3  ;;  %v897_v2 = vld [vmem:[#allocation8 + $0x158] sm:$0xff]  ;;  %v930_v59 = vld [vmem:[#allocation8 + $0x260] sm:$0xff] }
 0x17e   :  { %1995 = vmatprep.subr.bf16.mxu0 %v1994_v35  ;;  %2123 = vmatprep.subr.bf16.mxu1 %v2122_v7  ;;  %v901_v3 = vld [vmem:[#allocation8 + $0x178] sm:$0xff]  ;;  %v898_v35 = vld [vmem:[#allocation8 + $0x160] sm:$0xff]  ;;  %v2014_v7 = vpack.c.bf16 %v899_v1, %v895_v0  ;;  %v935_v0 = vld [vmem:[#allocation8 + $0x288] sm:$0xff] }
 0x17f   :  { %v2142_v8 = vpack.c.bf16 %v901_v3, %v897_v2  ;;  %v939_v1 = vld [vmem:[#allocation8 + $0x2a8] sm:$0xff]  ;;  %v937_v2 = vld [vmem:[#allocation8 + $0x298] sm:$0xff] }
 0x180   :  { %702 = vmatmul.mubr.f32.vlgmr.msra.gmra.mrb[2].mxu0 %v286_v18  ;;  %844 = vmatmul.mubr.f32.vlgmr.msra.gmra.mrb[2].mxu1 %v286_v18  ;;  %v906_v18 = vld [vmem:[#allocation8 + $0x1a0] sm:$0xff]  ;;  %v941_v3 = vld [vmem:[#allocation8 + $0x2b8] sm:$0xff] }
 0x181   :  { %1997 = vmatpush1.bf16.msra.mxu0 %v1996_v14  ;;  %2125 = vmatpush1.bf16.msra.mxu1 %v2124_v15  ;;  %v909_v14 = vld [vmem:[#allocation8 + $0x1b8] sm:$0xff]  ;;  %v2016_v15 = vpack.c.bf16 %v898_v35, %v894_v6  ;;  %v934_v6 = vld [vmem:[#allocation8 + $0x280] sm:$0xff] }
 0x182   :  { %1999 = vmatprep.subr.bf16.mxu0 %v1998_v53  ;;  %2127 = vmatprep.subr.bf16.mxu1 %v2126_v19  ;;  %v2018_v53 = vpack.c.bf16 %v907_v12, %v903_v11  ;;  %v2146_v19 = vpack.c.bf16 %v909_v14, %v905_v13  ;;  %v938_v35 = vld [vmem:[#allocation8 + $0x2a0] sm:$0xff]  ;;  %v943_v11 = vld [vmem:[#allocation8 + $0x2c8] sm:$0xff]  ;;  %v945_v13 = vld [vmem:[#allocation8 + $0x2d8] sm:$0xff] }
 0x183   :  { %v947_v12 = vld [vmem:[#allocation8 + $0x2e8] sm:$0xff]  ;;  %v949_v14 = vld [vmem:[#allocation8 + $0x2f8] sm:$0xff] }
 0x185   :  { %2001 = vmatpush1.bf16.msra.mxu0 %v2000_v26  ;;  %2129 = vmatpush1.bf16.msra.mxu1 %v2128_v27  ;;  %v2020_v26 = vpack.c.bf16 %v906_v18, %v902_v17  ;;  %v2148_v27 = vpack.c.bf16 %v908_v21, %v904_v20  ;;  %v942_v17 = vld [vmem:[#allocation8 + $0x2c0] sm:$0xff]  ;;  %v944_v20 = vld [vmem:[#allocation8 + $0x2d0] sm:$0xff] }
 0x186   :  { %2003 = vmatprep.subr.bf16.mxu0 %v2002_v30  ;;  %2131 = vmatprep.subr.bf16.mxu1 %v2130_v31  ;;  %v2022_v30 = vpack.c.bf16 %v915_v23, %v911_v22  ;;  %v2150_v31 = vpack.c.bf16 %v917_v25, %v913_v24  ;;  %v946_v18 = vld [vmem:[#allocation8 + $0x2e0] sm:$0xff]  ;;  %v948_v21 = vld [vmem:[#allocation8 + $0x2f0] sm:$0xff]  ;;  %v951_v22 = vld [vmem:[#allocation8 + $0x308] sm:$0xff] }
 0x187   :  { %v955_v23 = vld [vmem:[#allocation8 + $0x328] sm:$0xff]  ;;  %v953_v24 = vld [vmem:[#allocation8 + $0x318] sm:$0xff] }
 0x188   :  { %v957_v25 = vld [vmem:[#allocation8 + $0x338] sm:$0xff] }
 0x189   :  { %2005 = vmatpush1.bf16.msra.mxu0 %v2004_v43  ;;  %2133 = vmatpush1.bf16.msra.mxu1 %v2132_v45  ;;  %v2024_v43 = vpack.c.bf16 %v914_v29, %v910_v28  ;;  %v2152_v45 = vpack.c.bf16 %v916_v37, %v912_v32  ;;  %v950_v28 = vld [vmem:[#allocation8 + $0x300] sm:$0xff]  ;;  %v952_v32 = vld [vmem:[#allocation8 + $0x310] sm:$0xff] }
 0x18a   :  { %2007 = vmatprep.subr.bf16.mxu0 %v2006_v48  ;;  %2135 = vmatprep.subr.bf16.mxu1 %v2134_v49  ;;  %v2026_v48 = vpack.c.bf16 %v923_v40, %v919_v39  ;;  %v2154_v49 = vpack.c.bf16 %v925_v42, %v921_v41  ;;  %v954_v29 = vld [vmem:[#allocation8 + $0x320] sm:$0xff]  ;;  %v956_v37 = vld [vmem:[#allocation8 + $0x330] sm:$0xff]  ;;  %v959_v39 = vld [vmem:[#allocation8 + $0x348] sm:$0xff] }
 0x18b   :  { %v963_v40 = vld [vmem:[#allocation8 + $0x368] sm:$0xff]  ;;  %v961_v41 = vld [vmem:[#allocation8 + $0x358] sm:$0xff] }
 0x18c   :  { %v965_v42 = vld [vmem:[#allocation8 + $0x378] sm:$0xff] }
 0x18d   :  { %2009 = vmatpush1.bf16.msra.mxu0 %v2008_v57  ;;  %2137 = vmatpush1.bf16.msra.mxu1 %v2136_v58  ;;  %v2028_v57 = vpack.c.bf16 %v922_v47, %v918_v46  ;;  %v2156_v58 = vpack.c.bf16 %v924_v51, %v920_v50  ;;  %v958_v46 = vld [vmem:[#allocation8 + $0x340] sm:$0xff]  ;;  %v960_v50 = vld [vmem:[#allocation8 + $0x350] sm:$0xff] }
 0x18e   :  { %2011 = vmatprep.subr.bf16.mxu0 %v2010_v60  ;;  %2139 = vmatprep.subr.bf16.mxu1 %v2138_v61  ;;  %v2030_v60 = vpack.c.bf16 %v931_v54, %v927_v52  ;;  %v2158_v61 = vpack.c.bf16 %v933_v56, %v929_v55  ;;  %v962_v47 = vld [vmem:[#allocation8 + $0x360] sm:$0xff]  ;;  %v964_v51 = vld [vmem:[#allocation8 + $0x370] sm:$0xff]  ;;  %v967_v52 = vld [vmem:[#allocation8 + $0x388] sm:$0xff] }
 0x18f   :  { %v971_v54 = vld [vmem:[#allocation8 + $0x3a8] sm:$0xff]  ;;  %v969_v55 = vld [vmem:[#allocation8 + $0x398] sm:$0xff] }
 0x190   :  { %v973_v56 = vld [vmem:[#allocation8 + $0x3b8] sm:$0xff] }
 0x191   :  { %2013 = vmatpush1.bf16.msra.mxu0 %v2012_v4  ;;  %2141 = vmatpush1.bf16.msra.mxu1 %v2140_v5  ;;  %v2032_v4 = vpack.c.bf16 %v930_v59, %v926_v33  ;;  %v2160_v5 = vpack.c.bf16 %v932_v63, %v928_v62  ;;  %v966_v33 = vld [vmem:[#allocation8 + $0x380] sm:$0xff]  ;;  %v2050_v59 = vpack.c.bf16 %v971_v54, %v967_v52  ;;  %v968_v62 = vld [vmem:[#allocation8 + $0x390] sm:$0xff] }
 0x192   :  { %2015 = vmatprep.subr.bf16.mxu0 %v2014_v7  ;;  %2143 = vmatprep.subr.bf16.mxu1 %v2142_v8  ;;  %v2034_v7 = vpack.c.bf16 %v939_v1, %v935_v0  ;;  %v2162_v8 = vpack.c.bf16 %v941_v3, %v937_v2  ;;  %v972_v63 = vld [vmem:[#allocation8 + $0x3b0] sm:$0xff]  ;;  %v975_v2 = vld [vmem:[#allocation8 + $0x3c8] sm:$0xff] }
 0x193   :  { %v2180_v1 = vpack.c.bf16 %v972_v63, %v968_v62  ;;  %v979_v3 = vld [vmem:[#allocation8 + $0x3e8] sm:$0xff] }
 0x195   :  { %2017 = vmatpush1.bf16.msra.mxu0 %v2016_v15  ;;  %2145 = vmatpush1.bf16.msra.mxu1 %v2144_v16  ;;  %v2036_v15 = vpack.c.bf16 %v938_v35, %v934_v6  ;;  %v2164_v16 = vpack.c.bf16 %v940_v10, %v936_v9  ;;  %v981_v6 = vld [vmem:[#allocation8 + $0x3f8] sm:$0xff]  ;;  %v974_v35 = vld [vmem:[#allocation8 + $0x3c0] sm:$0xff]  ;;  %v976_v10 = vld [vmem:[#allocation8 + $0x3d0] sm:$0xff] }
 0x196   :  { %2019 = vmatprep.subr.bf16.mxu0 %v2018_v53  ;;  %2147 = vmatprep.subr.bf16.mxu1 %v2146_v19  ;;  %v2038_v53 = vpack.c.bf16 %v947_v12, %v943_v11  ;;  %v2166_v19 = vpack.c.bf16 %v949_v14, %v945_v13  ;;  %v980_v11 = vld [vmem:[#allocation8 + $0x3f0] sm:$0xff]  ;;  %v983_v13 = vld [vmem:[#allocation8 + $0x408] sm:$0xff] }
 0x197   :  { %v2184_v12 = vpack.c.bf16 %v980_v11, %v976_v10  ;;  %v987_v14 = vld [vmem:[#allocation8 + $0x428] sm:$0xff]  ;;  %v1008_v11 = vld [vmem:[#allocation8 + $0x4d0] sm:$0xff] }
 0x199   :  { %2021 = vmatpush1.bf16.msra.mxu0 %v2020_v26  ;;  %2149 = vmatpush1.bf16.msra.mxu1 %v2148_v27  ;;  %v2040_v26 = vpack.c.bf16 %v946_v18, %v942_v17  ;;  %v2168_v27 = vpack.c.bf16 %v948_v21, %v944_v20  ;;  %v989_v17 = vld [vmem:[#allocation8 + $0x438] sm:$0xff] }
 0x19a   :  { %2023 = vmatprep.subr.bf16.mxu0 %v2022_v30  ;;  %2151 = vmatprep.subr.bf16.mxu1 %v2150_v31  ;;  %v2042_v30 = vpack.c.bf16 %v955_v23, %v951_v22  ;;  %v2170_v31 = vpack.c.bf16 %v957_v25, %v953_v24  ;;  %v982_v24 = vld [vmem:[#allocation8 + $0x400] sm:$0xff] }
 0x19d   :  { %2025 = vmatpush1.bf16.msra.mxu0 %v2024_v43  ;;  %2153 = vmatpush1.bf16.msra.mxu1 %v2152_v45  ;;  %v2044_v43 = vpack.c.bf16 %v954_v29, %v950_v28  ;;  %v2172_v45 = vpack.c.bf16 %v956_v37, %v952_v32  ;;  %v986_v28 = vld [vmem:[#allocation8 + $0x420] sm:$0xff]  ;;  %v984_v29 = vld [vmem:[#allocation8 + $0x410] sm:$0xff]  ;;  %v991_v32 = vld [vmem:[#allocation8 + $0x448] sm:$0xff] }
 0x19e   :  { %2027 = vmatprep.subr.bf16.mxu0 %v2026_v48  ;;  %2155 = vmatprep.subr.bf16.mxu1 %v2154_v49  ;;  %v2046_v48 = vpack.c.bf16 %v963_v40, %v959_v39  ;;  %v2174_v49 = vpack.c.bf16 %v965_v42, %v961_v41  ;;  %v995_v39 = vld [vmem:[#allocation8 + $0x468] sm:$0xff]  ;;  %v993_v40 = vld [vmem:[#allocation8 + $0x458] sm:$0xff] }
 0x19f   :  { %v997_v41 = vld [vmem:[#allocation8 + $0x478] sm:$0xff]  ;;  %v2062_v52 = vpack.c.bf16 %v995_v39, %v991_v32  ;;  %v1022_v32 = vld [vmem:[#allocation8 + $0x540] sm:$0xff] }
 0x1a0   :  { %v2190_v54 = vpack.c.bf16 %v997_v41, %v993_v40  ;;  %v1024_v41 = vld [vmem:[#allocation8 + $0x550] sm:$0xff] }
 0x1a1   :  { %2029 = vmatpush1.bf16.msra.mxu0 %v2028_v57  ;;  %2157 = vmatpush1.bf16.msra.mxu1 %v2156_v58  ;;  %v2048_v57 = vpack.c.bf16 %v962_v47, %v958_v46  ;;  %v2176_v58 = vpack.c.bf16 %v964_v51, %v960_v50  ;;  %v990_v46 = vld [vmem:[#allocation8 + $0x440] sm:$0xff]  ;;  %v996_v50 = vld [vmem:[#allocation8 + $0x470] sm:$0xff]  ;;  %v999_v51 = vld [vmem:[#allocation8 + $0x488] sm:$0xff] }
 0x1a2   :  { %2031 = vmatprep.subr.bf16.mxu0 %v2030_v60  ;;  %2159 = vmatprep.subr.bf16.mxu1 %v2158_v61  ;;  %v2178_v60 = vpack.c.bf16 %v973_v56, %v969_v55  ;;  %v970_v61 = vld [vmem:[#allocation8 + $0x3a0] sm:$0xff]  ;;  %v1003_v55 = vld [vmem:[#allocation8 + $0x4a8] sm:$0xff]  ;;  %v1001_v56 = vld [vmem:[#allocation8 + $0x498] sm:$0xff] }
 0x1a3   :  { %v2052_v0 = vpack.c.bf16 %v970_v61, %v966_v33  ;;  %v994_v47 = vld [vmem:[#allocation8 + $0x460] sm:$0xff]  ;;  %v2066_v62 = vpack.c.bf16 %v1003_v55, %v999_v51  ;;  %v1032_v55 = vld [vmem:[#allocation8 + $0x590] sm:$0xff] }
 0x1a4   :  { %v2064_v33 = vpack.c.bf16 %v994_v47, %v990_v46  ;;  %v1002_v61 = vld [vmem:[#allocation8 + $0x4a0] sm:$0xff]  ;;  %v1033_v46 = vld [vmem:[#allocation8 + $0x598] sm:$0xff] }
 0x1a5   :  { %2033 = vmatpush1.bf16.msra.mxu0 %v2032_v4  ;;  %2161 = vmatpush1.bf16.msra.mxu1 %v2160_v5  ;;  %v977_v4 = vld [vmem:[#allocation8 + $0x3d8] sm:$0xff]  ;;  %v2054_v5 = vpack.c.bf16 %v979_v3, %v975_v2  ;;  %v1007_v2 = vld [vmem:[#allocation8 + $0x4c8] sm:$0xff]  ;;  %v1034_v51 = vld [vmem:[#allocation8 + $0x5a0] sm:$0xff] }
 0x1a6   :  { %2035 = vmatprep.subr.bf16.mxu0 %v2034_v7  ;;  %2163 = vmatprep.subr.bf16.mxu1 %v2162_v8  ;;  %v978_v7 = vld [vmem:[#allocation8 + $0x3e0] sm:$0xff]  ;;  %v2182_v8 = vpack.c.bf16 %v981_v6, %v977_v4  ;;  %v1011_v3 = vld [vmem:[#allocation8 + $0x4e8] sm:$0xff]  ;;  %v1009_v4 = vld [vmem:[#allocation8 + $0x4d8] sm:$0xff] }
 0x1a7   :  { %v2056_v9 = vpack.c.bf16 %v978_v7, %v974_v35  ;;  %v1006_v7 = vld [vmem:[#allocation8 + $0x4c0] sm:$0xff]  ;;  %v1037_v47 = vld [vmem:[#allocation8 + $0x5b8] sm:$0xff] }
 0x1a9   :  { %2037 = vmatpush1.bf16.msra.mxu0 %v2036_v15  ;;  %2165 = vmatpush1.bf16.msra.mxu1 %v2164_v16  ;;  %v985_v15 = vld [vmem:[#allocation8 + $0x418] sm:$0xff]  ;;  %v2058_v16 = vpack.c.bf16 %v987_v14, %v983_v13  ;;  %v1015_v13 = vld [vmem:[#allocation8 + $0x508] sm:$0xff] }
 0x1aa   :  { %2039 = vmatprep.subr.bf16.mxu0 %v2038_v53  ;;  %2167 = vmatprep.subr.bf16.mxu1 %v2166_v19  ;;  %v2186_v18 = vpack.c.bf16 %v989_v17, %v985_v15  ;;  %v2646_v53 = vld [vmem:[%s2685_s4] sm:$0xf]  ;;  %v1019_v14 = vld [vmem:[#allocation8 + $0x528] sm:$0xff] }
 0x1ab   :  { %v549_v19 = vrot.slane %v2646_v53, %v2616_v34  ;;  %v553_v20 = vrot.slane %v2646_v53, %v2624_v36  ;;  %v561_v21 = vrot.slane %v2646_v53, %v2629_v38  ;;  %v1017_v15 = vld [vmem:[#allocation8 + $0x518] sm:$0xff] }
 0x1ad   :  { %2041 = vmatpush1.bf16.msra.mxu0 %v2040_v26  ;;  %2169 = vmatpush1.bf16.msra.mxu1 %v2168_v27 }
 0x1ae   :  { %2043 = vmatprep.subr.bf16.mxu0 %v2042_v30  ;;  %2171 = vmatprep.subr.bf16.mxu1 %v2170_v31  ;;  %v988_v30 = vld [vmem:[#allocation8 + $0x430] sm:$0xff] }
 0x1b1   :  { %2045 = vmatpush1.bf16.msra.mxu0 %v2044_v43  ;;  %2173 = vmatpush1.bf16.msra.mxu1 %v2172_v45  ;;  %v2060_v43 = vpack.c.bf16 %v986_v28, %v982_v24  ;;  %v2188_v45 = vpack.c.bf16 %v988_v30, %v984_v29  ;;  %v1016_v24 = vld [vmem:[#allocation8 + $0x510] sm:$0xff]  ;;  %v1025_v28 = vld [vmem:[#allocation8 + $0x558] sm:$0xff] }
 0x1b2   :  { %2047 = vmatprep.subr.bf16.mxu0 %v2046_v48  ;;  %2175 = vmatprep.subr.bf16.mxu1 %v2174_v49  ;;  %v992_v49 = vld [vmem:[#allocation8 + $0x450] sm:$0xff]  ;;  %v1029_v29 = vld [vmem:[#allocation8 + $0x578] sm:$0xff] }
 0x1b3   :  { %v2206_v40 = vpack.c.bf16 %v1029_v29, %v1025_v28  ;;  %v1063_v28 = vld [vmem:[#allocation8 + $0x688] sm:$0xff] }
 0x1b4   :  { %v1067_v29 = vld [vmem:[#allocation8 + $0x6a8] sm:$0xff] }
 0x1b5   :  { %2049 = vmatpush1.bf16.msra.mxu0 %v2048_v57  ;;  %2177 = vmatpush1.bf16.msra.mxu1 %v2176_v58  ;;  %v1005_v57 = vld [vmem:[#allocation8 + $0x4b8] sm:$0xff] }
 0x1b6   :  { %2051 = vmatprep.subr.bf16.mxu0 %v2050_v59  ;;  %2179 = vmatprep.subr.bf16.mxu1 %v2178_v60  ;;  %v2192_v59 = vpack.c.bf16 %v996_v50, %v992_v49  ;;  %v998_v60 = vld [vmem:[#allocation8 + $0x480] sm:$0xff]  ;;  %v2194_v63 = vpack.c.bf16 %v1005_v57, %v1001_v56  ;;  %v1036_v56 = vld [vmem:[#allocation8 + $0x5b0] sm:$0xff]  ;;  %v1039_v57 = vld [vmem:[#allocation8 + $0x5c8] sm:$0xff] }
 0x1b7   :  { %v2068_v6 = vpack.c.bf16 %v1002_v61, %v998_v60  ;;  %v1030_v50 = vld [vmem:[#allocation8 + $0x580] sm:$0xff]  ;;  %v2212_v61 = vpack.c.bf16 %v1036_v56, %v1032_v55 }
 0x1b8   :  { %v2084_v60 = vpack.c.bf16 %v1034_v51, %v1030_v50 }
 0x1b9   :  { %2053 = vmatpush1.bf16.msra.mxu0 %v2052_v0  ;;  %2181 = vmatpush1.bf16.msra.mxu1 %v2180_v1  ;;  %v1000_v0 = vld [vmem:[#allocation8 + $0x490] sm:$0xff] }
 0x1ba   :  { %2055 = vmatprep.subr.bf16.mxu0 %v2054_v5  ;;  %2183 = vmatprep.subr.bf16.mxu1 %v2182_v8  ;;  %v1004_v1 = vld [vmem:[#allocation8 + $0x4b0] sm:$0xff]  ;;  %v1013_v5 = vld [vmem:[#allocation8 + $0x4f8] sm:$0xff]  ;;  %v1010_v8 = vld [vmem:[#allocation8 + $0x4e0] sm:$0xff] }
 0x1bb   :  { %v2196_v35 = vpack.c.bf16 %v1004_v1, %v1000_v0  ;;  %v2198_v10 = vpack.c.bf16 %v1013_v5, %v1009_v4  ;;  %v2072_v17 = vpack.c.bf16 %v1010_v8, %v1006_v7  ;;  %v1047_v4 = vld [vmem:[#allocation8 + $0x608] sm:$0xff] }
 0x1bc   :  { %v1051_v5 = vld [vmem:[#allocation8 + $0x628] sm:$0xff] }
 0x1bd   :  { %2057 = vmatpush1.bf16.msra.mxu0 %v2056_v9  ;;  %2185 = vmatpush1.bf16.msra.mxu1 %v2184_v12  ;;  %v2070_v9 = vpack.c.bf16 %v1011_v3, %v1007_v2  ;;  %v1012_v12 = vld [vmem:[#allocation8 + $0x4f0] sm:$0xff] }
 0x1be   :  { %2059 = vmatprep.subr.bf16.mxu0 %v2058_v16  ;;  %2187 = vmatprep.subr.bf16.mxu1 %v2186_v18  ;;  %v1021_v16 = vld [vmem:[#allocation8 + $0x538] sm:$0xff]  ;;  %v2200_v18 = vpack.c.bf16 %v1012_v12, %v1008_v11  ;;  %v1040_v2 = vld [vmem:[#allocation8 + $0x5d0] sm:$0xff]  ;;  %v2090_v11 = vpack.c.bf16 %v1051_v5, %v1047_v4 }
 0x1bf   :  { %v1044_v3 = vld [vmem:[#allocation8 + $0x5f0] sm:$0xff] }
 0x1c0   :  { %v2216_v8 = vpack.c.bf16 %v1044_v3, %v1040_v2  ;;  %v1080_v4 = vld [vmem:[#allocation8 + $0x710] sm:$0xff] }
 0x1c1   :  { %v1084_v5 = vld [vmem:[#allocation8 + $0x730] sm:$0xff] }
 0x253   :  { %v703_v22 = vpop.f32.mrb[2].mxu0  ;;  %v2654_v23 = vpop.f32.mrb[2].mxu1 }
 0x254   :  { %v2314_v25 = vadd.f32 %v703_v22, %v549_v19  ;;  %v705_v26 = vpop.f32.mrb[3].mxu0  ;;  %v847_v27 = vpop.f32.mrb[3].mxu1  ;;  %v1014_v19 = vld [vmem:[#allocation8 + $0x500] sm:$0xff]  ;;  %v2202_v22 = vpack.c.bf16 %v1021_v16, %v1017_v15  ;;  %v1055_v15 = vld [vmem:[#allocation8 + $0x648] sm:$0xff] }
 0x255   :  { %v2315_v31 = vadd.f32 %v705_v26, %v553_v20  ;;  %v2317_v37 = vadd.f32 %v847_v27, %v561_v21  ;;  %v1018_v20 = vld [vmem:[#allocation8 + $0x520] sm:$0xff]  ;;  %v2074_v21 = vpack.c.bf16 %v1019_v14, %v1015_v13  ;;  %v1023_v26 = vld [vmem:[#allocation8 + $0x548] sm:$0xff]  ;;  %v1048_v13 = vld [vmem:[#allocation8 + $0x610] sm:$0xff] }
 0x256   :  { %v850_v48 = vmax.f32 %v2314_v25, 0.0  ;;  %v1020_v25 = vld [vmem:[#allocation8 + $0x530] sm:$0xff]  ;;  %v1027_v27 = vld [vmem:[#allocation8 + $0x568] sm:$0xff]  ;;  %v2076_v30 = vpack.c.bf16 %v1018_v20, %v1014_v19 }
 0x257   :  { %v851_v42 = vmax.f32 %v2315_v31, 0.0  ;;  %v853_v58 = vmax.f32 %v2317_v37, 0.0  ;;  %v2204_v31 = vpack.c.bf16 %v1020_v25, %v1016_v24  ;;  %v1026_v37 = vld [vmem:[#allocation8 + $0x560] sm:$0xff]  ;;  %v2078_v39 = vpack.c.bf16 %v1027_v27, %v1023_v26  ;;  %v1052_v14 = vld [vmem:[#allocation8 + $0x630] sm:$0xff]  ;;  %v1059_v16 = vld [vmem:[#allocation8 + $0x668] sm:$0xff] }
 0x258   :  { %v2220_v20 = vpack.c.bf16 %v1052_v14, %v1048_v13  ;;  %v2094_v24 = vpack.c.bf16 %v1059_v16, %v1055_v15  ;;  %v1056_v26 = vld [vmem:[#allocation8 + $0x650] sm:$0xff] }
 0x259   :  { %1196 = vmatprep.mubr.f32.mxu0 %v851_v42  ;;  %1338 = vmatprep.mubr.f32.mxu1 %v851_v42  ;;  %v1028_v42 = vld [vmem:[#allocation8 + $0x570] sm:$0xff] }
 0x25a   :  { %1197 = vmatmul.mubr.f32.vlgmr.msra.gmra.mrb[4].mxu0 %v850_v48  ;;  %1339 = vmatmul.mubr.f32.vlgmr.msra.gmra.mrb[4].mxu1 %v850_v48  ;;  %v2080_v48 = vpack.c.bf16 %v1026_v37, %v1022_v32  ;;  %v2208_v49 = vpack.c.bf16 %v1028_v42, %v1024_v41  ;;  %v1060_v27 = vld [vmem:[#allocation8 + $0x670] sm:$0xff]  ;;  %v2098_v41 = vpack.c.bf16 %v1067_v29, %v1063_v28 }
 0x25b   :  { %2061 = vmatpush1.bf16.msra.mxu0 %v2060_v43  ;;  %2189 = vmatpush1.bf16.msra.mxu1 %v2188_v45  ;;  %v1031_v43 = vld [vmem:[#allocation8 + $0x588] sm:$0xff]  ;;  %v2224_v37 = vpack.c.bf16 %v1060_v27, %v1056_v26  ;;  %v1088_v15 = vld [vmem:[#allocation8 + $0x750] sm:$0xff] }
 0x25c   :  { %1267 = vmatprep.mubr.f32.mxu0 %v853_v58  ;;  %1409 = vmatprep.mubr.f32.mxu1 %v853_v58  ;;  %v1035_v45 = vld [vmem:[#allocation8 + $0x5a8] sm:$0xff]  ;;  %v1092_v16 = vld [vmem:[#allocation8 + $0x770] sm:$0xff] }
 0x25d   :  { %2063 = vmatprep.subr.bf16.mxu0 %v2062_v52  ;;  %2191 = vmatprep.subr.bf16.mxu1 %v2190_v54  ;;  %v2082_v52 = vpack.c.bf16 %v1035_v45, %v1031_v43  ;;  %v2210_v54 = vpack.c.bf16 %v1037_v47, %v1033_v46  ;;  %v1043_v58 = vld [vmem:[#allocation8 + $0x5e8] sm:$0xff]  ;;  %v1064_v43 = vld [vmem:[#allocation8 + $0x690] sm:$0xff] }
 0x25e   :  { %v2086_v0 = vpack.c.bf16 %v1043_v58, %v1039_v57  ;;  %v1068_v45 = vld [vmem:[#allocation8 + $0x6b0] sm:$0xff]  ;;  %v1071_v46 = vld [vmem:[#allocation8 + $0x6c8] sm:$0xff] }
 0x25f   :  { %2065 = vmatpush1.bf16.msra.mxu0 %v2064_v33  ;;  %2193 = vmatpush1.bf16.msra.mxu1 %v2192_v59  ;;  %v1041_v33 = vld [vmem:[#allocation8 + $0x5d8] sm:$0xff]  ;;  %v1075_v47 = vld [vmem:[#allocation8 + $0x6e8] sm:$0xff]  ;;  %v2228_v51 = vpack.c.bf16 %v1068_v45, %v1064_v43  ;;  %v1072_v57 = vld [vmem:[#allocation8 + $0x6d0] sm:$0xff]  ;;  %v557_v43 = vrot.slane %v2646_v53, %v2638_v44 }
 0x260   :  { %2067 = vmatprep.subr.bf16.mxu0 %v2066_v62  ;;  %2195 = vmatprep.subr.bf16.mxu1 %v2194_v63  ;;  %v1045_v59 = vld [vmem:[#allocation8 + $0x5f8] sm:$0xff]  ;;  %v1038_v62 = vld [vmem:[#allocation8 + $0x5c0] sm:$0xff]  ;;  %v2102_v55 = vpack.c.bf16 %v1075_v47, %v1071_v46  ;;  %v1076_v58 = vld [vmem:[#allocation8 + $0x6f0] sm:$0xff] }
 0x261   :  { %v1042_v63 = vld [vmem:[#allocation8 + $0x5e0] sm:$0xff]  ;;  %v2214_v1 = vpack.c.bf16 %v1045_v59, %v1041_v33  ;;  %v1079_v33 = vld [vmem:[#allocation8 + $0x708] sm:$0xff]  ;;  %v1096_v28 = vld [vmem:[#allocation8 + $0x790] sm:$0xff] }
 0x262   :  { %v2088_v7 = vpack.c.bf16 %v1042_v63, %v1038_v62  ;;  %v1083_v59 = vld [vmem:[#allocation8 + $0x728] sm:$0xff]  ;;  %v2232_v63 = vpack.c.bf16 %v1076_v58, %v1072_v57  ;;  %v1100_v29 = vld [vmem:[#allocation8 + $0x7b0] sm:$0xff]  ;;  %v2316_v58 = vadd.f32 %v2654_v23, %v557_v43 }
 0x263   :  { %2069 = vmatpush1.bf16.msra.mxu0 %v2068_v6  ;;  %2197 = vmatpush1.bf16.msra.mxu1 %v2196_v35  ;;  %v1049_v6 = vld [vmem:[#allocation8 + $0x618] sm:$0xff]  ;;  %v2106_v2 = vpack.c.bf16 %v1083_v59, %v1079_v33  ;;  %v1104_v47 = vld [vmem:[#allocation8 + $0x7d0] sm:$0xff]  ;;  %v1421_v57 = vld [vmem:[#allocation10 + $0x8] sm:$0xff] }
 0x264   :  { %2071 = vmatprep.subr.bf16.mxu0 %v2070_v9  ;;  %2199 = vmatprep.subr.bf16.mxu1 %v2198_v10  ;;  %v1053_v35 = vld [vmem:[#allocation8 + $0x638] sm:$0xff]  ;;  %v1046_v9 = vld [vmem:[#allocation8 + $0x600] sm:$0xff] }
 0x265   :  { %v1050_v10 = vld [vmem:[#allocation8 + $0x620] sm:$0xff]  ;;  %v2218_v12 = vpack.c.bf16 %v1053_v35, %v1049_v6  ;;  %v1087_v6 = vld [vmem:[#allocation8 + $0x748] sm:$0xff] }
 0x266   :  { %v2092_v19 = vpack.c.bf16 %v1050_v10, %v1046_v9  ;;  %v1091_v35 = vld [vmem:[#allocation8 + $0x768] sm:$0xff]  ;;  %v2236_v10 = vpack.c.bf16 %v1084_v5, %v1080_v4  ;;  %v1452_v59 = vld [vmem:[#allocation10 + $0x100] sm:$0xff]  ;;  %v1423_v4 = vld [vmem:[#allocation10 + $0x18] sm:$0xff]  ;;  %v852_v5 = vmax.f32 %v2316_v58, 0.0 }
 0x267   :  { %2073 = vmatpush1.bf16.msra.mxu0 %v2072_v17  ;;  %2201 = vmatpush1.bf16.msra.mxu1 %v2200_v18  ;;  %v1057_v17 = vld [vmem:[#allocation8 + $0x658] sm:$0xff]  ;;  %v2110_v13 = vpack.c.bf16 %v1091_v35, %v1087_v6  ;;  %v1454_v35 = vld [vmem:[#allocation10 + $0x110] sm:$0xff] }
 0x268   :  { %2075 = vmatprep.subr.bf16.mxu0 %v2074_v21  ;;  %2203 = vmatprep.subr.bf16.mxu1 %v2202_v22  ;;  %v1061_v18 = vld [vmem:[#allocation8 + $0x678] sm:$0xff]  ;;  %v1054_v21 = vld [vmem:[#allocation8 + $0x640] sm:$0xff]  ;;  %v1430_v58 = vld [vmem:[#allocation10 + $0x50] sm:$0xff] }
 0x269   :  { %v1058_v22 = vld [vmem:[#allocation8 + $0x660] sm:$0xff]  ;;  %v2222_v25 = vpack.c.bf16 %v1061_v18, %v1057_v17  ;;  %v1095_v17 = vld [vmem:[#allocation8 + $0x788] sm:$0xff] }
 0x26a   :  { %v2096_v32 = vpack.c.bf16 %v1058_v22, %v1054_v21  ;;  %v1099_v18 = vld [vmem:[#allocation8 + $0x7a8] sm:$0xff]  ;;  %v2240_v22 = vpack.c.bf16 %v1092_v16, %v1088_v15 }
 0x26b   :  { %2077 = vmatpush1.bf16.msra.mxu0 %v2076_v30  ;;  %2205 = vmatpush1.bf16.msra.mxu1 %v2204_v31  ;;  %v1065_v30 = vld [vmem:[#allocation8 + $0x698] sm:$0xff]  ;;  %v2114_v26 = vpack.c.bf16 %v1099_v18, %v1095_v17  ;;  %v1425_v15 = vld [vmem:[#allocation10 + $0x28] sm:$0xff]  ;;  %v1456_v18 = vld [vmem:[#allocation10 + $0x120] sm:$0xff] }
 0x26c   :  { %2079 = vmatprep.subr.bf16.mxu0 %v2078_v39  ;;  %2207 = vmatprep.subr.bf16.mxu1 %v2206_v40  ;;  %v1069_v31 = vld [vmem:[#allocation8 + $0x6b8] sm:$0xff]  ;;  %v1062_v39 = vld [vmem:[#allocation8 + $0x680] sm:$0xff] }
 0x26d   :  { %v1066_v40 = vld [vmem:[#allocation8 + $0x6a0] sm:$0xff]  ;;  %v2226_v42 = vpack.c.bf16 %v1069_v31, %v1065_v30  ;;  %v1103_v30 = vld [vmem:[#allocation8 + $0x7c8] sm:$0xff] }
 0x26e   :  { %v2100_v50 = vpack.c.bf16 %v1066_v40, %v1062_v39  ;;  %v1107_v31 = vld [vmem:[#allocation8 + $0x7e8] sm:$0xff]  ;;  %v2244_v40 = vpack.c.bf16 %v1100_v29, %v1096_v28  ;;  %v1427_v28 = vld [vmem:[#allocation10 + $0x38] sm:$0xff] }
 0x26f   :  { %2081 = vmatpush1.bf16.msra.mxu0 %v2080_v48  ;;  %2209 = vmatpush1.bf16.msra.mxu1 %v2208_v49  ;;  %v1073_v48 = vld [vmem:[#allocation8 + $0x6d8] sm:$0xff]  ;;  %v2118_v45 = vpack.c.bf16 %v1107_v31, %v1103_v30  ;;  %v1458_v31 = vld [vmem:[#allocation10 + $0x130] sm:$0xff] }
 0x270   :  { %2083 = vmatprep.subr.bf16.mxu0 %v2082_v52  ;;  %2211 = vmatprep.subr.bf16.mxu1 %v2210_v54  ;;  %v1077_v49 = vld [vmem:[#allocation8 + $0x6f8] sm:$0xff]  ;;  %v1070_v52 = vld [vmem:[#allocation8 + $0x6c0] sm:$0xff] }
 0x271   :  { %v1074_v54 = vld [vmem:[#allocation8 + $0x6e0] sm:$0xff]  ;;  %v2230_v56 = vpack.c.bf16 %v1077_v49, %v1073_v48  ;;  %v1108_v48 = vld [vmem:[#allocation8 + $0x7f0] sm:$0xff] }
 0x272   :  { %v2104_v62 = vpack.c.bf16 %v1074_v54, %v1070_v52  ;;  %v1436_v49 = vld [vmem:[#allocation10 + $0x80] sm:$0xff]  ;;  %v1469_v52 = vld [vmem:[#allocation10 + $0x188] sm:$0xff] }
 0x273   :  { %2085 = vmatpush1.bf16.msra.mxu0 %v2084_v60  ;;  %2213 = vmatpush1.bf16.msra.mxu1 %v2212_v61  ;;  %v1081_v60 = vld [vmem:[#allocation8 + $0x718] sm:$0xff] }
 0x274   :  { %2087 = vmatprep.subr.bf16.mxu0 %v2086_v0  ;;  %2215 = vmatprep.subr.bf16.mxu1 %v2214_v1  ;;  %v1085_v61 = vld [vmem:[#allocation8 + $0x738] sm:$0xff]  ;;  %v1078_v0 = vld [vmem:[#allocation8 + $0x700] sm:$0xff] }
 0x275   :  { %v1082_v1 = vld [vmem:[#allocation8 + $0x720] sm:$0xff]  ;;  %v2234_v3 = vpack.c.bf16 %v1085_v61, %v1081_v60  ;;  %v1453_v60 = vld [vmem:[#allocation10 + $0x108] sm:$0xff]  ;;  %v1438_v61 = vld [vmem:[#allocation10 + $0x90] sm:$0xff] }
 0x276   :  { %v2108_v9 = vpack.c.bf16 %v1082_v1, %v1078_v0  ;;  %v1471_v0 = vld [vmem:[#allocation10 + $0x198] sm:$0xff] }
 0x277   :  { %2089 = vmatpush1.bf16.msra.mxu0 %v2088_v7  ;;  %2217 = vmatpush1.bf16.msra.mxu1 %v2216_v8  ;;  %v1089_v7 = vld [vmem:[#allocation8 + $0x758] sm:$0xff] }
 0x278   :  { %2091 = vmatprep.subr.bf16.mxu0 %v2090_v11  ;;  %2219 = vmatprep.subr.bf16.mxu1 %v2218_v12  ;;  %v1093_v8 = vld [vmem:[#allocation8 + $0x778] sm:$0xff]  ;;  %v1086_v11 = vld [vmem:[#allocation8 + $0x740] sm:$0xff] }
 0x279   :  { %v1090_v12 = vld [vmem:[#allocation8 + $0x760] sm:$0xff]  ;;  %v2238_v14 = vpack.c.bf16 %v1093_v8, %v1089_v7  ;;  %v1455_v7 = vld [vmem:[#allocation10 + $0x118] sm:$0xff] }
 0x27a   :  { %v2112_v21 = vpack.c.bf16 %v1090_v12, %v1086_v11  ;;  %v1440_v8 = vld [vmem:[#allocation10 + $0xa0] sm:$0xff]  ;;  %v1473_v11 = vld [vmem:[#allocation10 + $0x1a8] sm:$0xff] }
 0x27b   :  { %2093 = vmatpush1.bf16.msra.mxu0 %v2092_v19  ;;  %2221 = vmatpush1.bf16.msra.mxu1 %v2220_v20  ;;  %v1097_v19 = vld [vmem:[#allocation8 + $0x798] sm:$0xff] }
 0x27c   :  { %2095 = vmatprep.subr.bf16.mxu0 %v2094_v24  ;;  %2223 = vmatprep.subr.bf16.mxu1 %v2222_v25  ;;  %v1101_v20 = vld [vmem:[#allocation8 + $0x7b8] sm:$0xff]  ;;  %v1094_v24 = vld [vmem:[#allocation8 + $0x780] sm:$0xff] }
 0x27d   :  { %v1098_v25 = vld [vmem:[#allocation8 + $0x7a0] sm:$0xff]  ;;  %v2242_v27 = vpack.c.bf16 %v1101_v20, %v1097_v19  ;;  %v1457_v19 = vld [vmem:[#allocation10 + $0x128] sm:$0xff]  ;;  %v1442_v20 = vld [vmem:[#allocation10 + $0xb0] sm:$0xff] }
 0x27e   :  { %v2116_v39 = vpack.c.bf16 %v1098_v25, %v1094_v24  ;;  %v1475_v24 = vld [vmem:[#allocation10 + $0x1b8] sm:$0xff] }
 0x27f   :  { %2097 = vmatpush1.bf16.msra.mxu0 %v2096_v32  ;;  %2225 = vmatpush1.bf16.msra.mxu1 %v2224_v37  ;;  %v1105_v32 = vld [vmem:[#allocation8 + $0x7d8] sm:$0xff] }
 0x280   :  { %2099 = vmatprep.subr.bf16.mxu0 %v2098_v41  ;;  %2227 = vmatprep.subr.bf16.mxu1 %v2226_v42  ;;  %v1109_v37 = vld [vmem:[#allocation8 + $0x7f8] sm:$0xff]  ;;  %v1102_v41 = vld [vmem:[#allocation8 + $0x7c0] sm:$0xff] }
 0x281   :  { %v1106_v42 = vld [vmem:[#allocation8 + $0x7e0] sm:$0xff]  ;;  %v2246_v46 = vpack.c.bf16 %v1109_v37, %v1105_v32  ;;  %v1459_v32 = vld [vmem:[#allocation10 + $0x138] sm:$0xff] }
 0x282   :  { %v2120_v54 = vpack.c.bf16 %v1106_v42, %v1102_v41  ;;  %v1444_v37 = vld [vmem:[#allocation10 + $0xc0] sm:$0xff]  ;;  %v1477_v41 = vld [vmem:[#allocation10 + $0x1c8] sm:$0xff]  ;;  %v2296_v43 = vpack.c.bf16 %v1459_v32, %v1458_v31 }
 0x283   :  { %2101 = vmatpush1.bf16.msra.mxu0 %v2100_v50  ;;  %2229 = vmatpush1.bf16.msra.mxu1 %v2228_v51  ;;  %v1437_v50 = vld [vmem:[#allocation10 + $0x88] sm:$0xff]  ;;  %v1468_v51 = vld [vmem:[#allocation10 + $0x180] sm:$0xff] }
 0x284   :  { %2103 = vmatprep.subr.bf16.mxu0 %v2102_v55  ;;  %2231 = vmatprep.subr.bf16.mxu1 %v2230_v56  ;;  %v2248_v55 = vpack.c.bf16 %v1108_v48, %v1104_v47  ;;  %v1420_v56 = vld [vmem:[#allocation10] sm:$0xff]  ;;  %v2250_v53 = vpack.c.bf16 %v1437_v50, %v1436_v49  ;;  %v2282_v33 = vpack.c.bf16 %v1469_v52, %v1468_v51  ;;  %v1461_v50 = vld [vmem:[#allocation10 + $0x148] sm:$0xff]  ;;  %v1446_v51 = vld [vmem:[#allocation10 + $0xd0] sm:$0xff] }
 0x285   :  { %v2252_v1 = vpack.c.bf16 %v1421_v57, %v1420_v56  ;;  %v1460_v49 = vld [vmem:[#allocation10 + $0x140] sm:$0xff]  ;;  %v1447_v52 = vld [vmem:[#allocation10 + $0xd8] sm:$0xff] }
 0x286   :  { %v2300_v57 = vpack.c.bf16 %v1461_v50, %v1460_v49 }
 0x287   :  { %2105 = vmatpush1.bf16.msra.mxu0 %v2104_v62  ;;  %2233 = vmatpush1.bf16.msra.mxu1 %v2232_v63  ;;  %v1439_v62 = vld [vmem:[#allocation10 + $0x98] sm:$0xff]  ;;  %v1470_v63 = vld [vmem:[#allocation10 + $0x190] sm:$0xff] }
 0x288   :  { %2107 = vmatprep.subr.bf16.mxu0 %v2106_v2  ;;  %2235 = vmatprep.subr.bf16.mxu1 %v2234_v3  ;;  %v2284_v2 = vpack.c.bf16 %v1453_v60, %v1452_v59  ;;  %v1422_v3 = vld [vmem:[#allocation10 + $0x10] sm:$0xff]  ;;  %v2254_v23 = vpack.c.bf16 %v1439_v62, %v1438_v61  ;;  %v2286_v6 = vpack.c.bf16 %v1471_v0, %v1470_v63  ;;  %v1463_v61 = vld [vmem:[#allocation10 + $0x158] sm:$0xff]  ;;  %v1448_v62 = vld [vmem:[#allocation10 + $0xe0] sm:$0xff] }
 0x289   :  { %v2256_v12 = vpack.c.bf16 %v1423_v4, %v1422_v3  ;;  %v1462_v60 = vld [vmem:[#allocation10 + $0x150] sm:$0xff]  ;;  %v1449_v63 = vld [vmem:[#allocation10 + $0xe8] sm:$0xff]  ;;  %v1480_v0 = vld [vmem:[#allocation10 + $0x1e0] sm:$0xff] }
 0x28a   :  { %v2304_v3 = vpack.c.bf16 %v1463_v61, %v1462_v60  ;;  %v2274_v4 = vpack.c.bf16 %v1449_v63, %v1448_v62 }
 0x28b   :  { %2109 = vmatpush1.bf16.msra.mxu0 %v2108_v9  ;;  %2237 = vmatpush1.bf16.msra.mxu1 %v2236_v10  ;;  %v1441_v9 = vld [vmem:[#allocation10 + $0xa8] sm:$0xff]  ;;  %v1472_v10 = vld [vmem:[#allocation10 + $0x1a0] sm:$0xff] }
 0x28c   :  { %2111 = vmatprep.subr.bf16.mxu0 %v2110_v13  ;;  %2239 = vmatprep.subr.bf16.mxu1 %v2238_v14  ;;  %v2288_v13 = vpack.c.bf16 %v1455_v7, %v1454_v35  ;;  %v1424_v14 = vld [vmem:[#allocation10 + $0x20] sm:$0xff]  ;;  %v2258_v16 = vpack.c.bf16 %v1441_v9, %v1440_v8  ;;  %v2290_v17 = vpack.c.bf16 %v1473_v11, %v1472_v10  ;;  %v1465_v8 = vld [vmem:[#allocation10 + $0x168] sm:$0xff]  ;;  %v1450_v10 = vld [vmem:[#allocation10 + $0xf0] sm:$0xff] }
 0x28d   :  { %v2260_v25 = vpack.c.bf16 %v1425_v15, %v1424_v14  ;;  %v1464_v35 = vld [vmem:[#allocation10 + $0x160] sm:$0xff]  ;;  %v1451_v11 = vld [vmem:[#allocation10 + $0xf8] sm:$0xff]  ;;  %v1434_v15 = vld [vmem:[#allocation10 + $0x70] sm:$0xff] }
 0x28e   :  { %v2308_v9 = vpack.c.bf16 %v1465_v8, %v1464_v35  ;;  %v1483_v14 = vld [vmem:[#allocation10 + $0x1f8] sm:$0xff] }
 0x28f   :  { %2113 = vmatpush1.bf16.msra.mxu0 %v2112_v21  ;;  %2241 = vmatpush1.bf16.msra.mxu1 %v2240_v22  ;;  %v1443_v21 = vld [vmem:[#allocation10 + $0xb8] sm:$0xff]  ;;  %v1474_v22 = vld [vmem:[#allocation10 + $0x1b0] sm:$0xff] }
 0x290   :  { %2115 = vmatprep.subr.bf16.mxu0 %v2114_v26  ;;  %2243 = vmatprep.subr.bf16.mxu1 %v2242_v27  ;;  %v2292_v26 = vpack.c.bf16 %v1457_v19, %v1456_v18  ;;  %v1426_v27 = vld [vmem:[#allocation10 + $0x30] sm:$0xff]  ;;  %v2262_v29 = vpack.c.bf16 %v1443_v21, %v1442_v20  ;;  %v2294_v30 = vpack.c.bf16 %v1475_v24, %v1474_v22  ;;  %v1467_v20 = vld [vmem:[#allocation10 + $0x178] sm:$0xff] }
 0x291   :  { %v2264_v42 = vpack.c.bf16 %v1427_v28, %v1426_v27  ;;  %v1466_v19 = vld [vmem:[#allocation10 + $0x170] sm:$0xff]  ;;  %v1110_v22 = vld [vmem:[%s2687_s6] sm:$0xf] }
 0x292   :  { %v2312_v21 = vpack.c.bf16 %v1467_v20, %v1466_v19  ;;  %v1115_v24 = vrot.slane %v1110_v22, %v2616_v34  ;;  %v1127_v27 = vrot.slane %v1110_v22, %v2629_v38  ;;  %v1651_v38 = vld [vmem:[%s2689_s8] ss:$0 sm:$0xff] }
 0x293   :  { %2117 = vmatpush1.bf16.msra.mxu0 %v2116_v39  ;;  %2245 = vmatpush1.bf16.msra.mxu1 %v2244_v40  ;;  %v1445_v39 = vld [vmem:[#allocation10 + $0xc8] sm:$0xff]  ;;  %v1476_v40 = vld [vmem:[#allocation10 + $0x1c0] sm:$0xff] }
 0x294   :  { %2119 = vmatprep.subr.bf16.mxu0 %v2118_v45  ;;  %2247 = vmatprep.subr.bf16.mxu1 %v2246_v46  ;;  %v1428_v45 = vld [vmem:[#allocation10 + $0x40] sm:$0xff]  ;;  %v1429_v46 = vld [vmem:[#allocation10 + $0x48] sm:$0xff]  ;;  %v2266_v47 = vpack.c.bf16 %v1445_v39, %v1444_v37  ;;  %v2298_v48 = vpack.c.bf16 %v1477_v41, %v1476_v40 }
 0x295   :  { %v2268_v56 = vpack.c.bf16 %v1429_v46, %v1428_v45 }
 0x297   :  { %2121 = vmatpush1.bf16.msra.mxu0 %v2120_v54  ;;  %2249 = vmatpush1.bf16.msra.mxu1 %v2248_v55  ;;  %v1478_v54 = vld [vmem:[#allocation10 + $0x1d0] sm:$0xff]  ;;  %v1479_v55 = vld [vmem:[#allocation10 + $0x1d8] sm:$0xff] }
 0x298   :  { %2251 = vmatprep.subr.bf16.mxu0 %v2250_v53  ;;  %2283 = vmatprep.subr.bf16.mxu1 %v2282_v33  ;;  %v1431_v53 = vld [vmem:[#allocation10 + $0x58] sm:$0xff]  ;;  %v2270_v33 = vpack.c.bf16 %v1447_v52, %v1446_v51  ;;  %v2302_v59 = vpack.c.bf16 %v1479_v55, %v1478_v54 }
 0x29a   :  { %1268 = vmatmul.mubr.f32.vlgmr.msra.gmra.mrb[4].mxu0 %v852_v5  ;;  %1410 = vmatmul.mubr.f32.vlgmr.msra.gmra.mrb[4].mxu1 %v852_v5 }
 0x29b   :  { %2253 = vmatpush3.bf16.msra.mxu0 %v2252_v1  ;;  %2285 = vmatpush3.bf16.msra.mxu1 %v2284_v2  ;;  %v1481_v1 = vld [vmem:[#allocation10 + $0x1e8] sm:$0xff]  ;;  %v2272_v2 = vpack.c.bf16 %v1431_v53, %v1430_v58 }
 0x29c   :  { %2255 = vmatprep.subr.bf16.mxu0 %v2254_v23  ;;  %2287 = vmatprep.subr.bf16.mxu1 %v2286_v6  ;;  %v2306_v5 = vpack.c.bf16 %v1481_v1, %v1480_v0  ;;  %v1432_v23 = vld [vmem:[#allocation10 + $0x60] sm:$0xff]  ;;  %v1433_v6 = vld [vmem:[#allocation10 + $0x68] sm:$0xff] }
 0x29d   :  { %v2276_v7 = vpack.c.bf16 %v1433_v6, %v1432_v23 }
 0x29f   :  { %2257 = vmatpush3.bf16.msra.mxu0 %v2256_v12  ;;  %2289 = vmatpush3.bf16.msra.mxu1 %v2288_v13  ;;  %v1482_v12 = vld [vmem:[#allocation10 + $0x1f0] sm:$0xff]  ;;  %v2278_v13 = vpack.c.bf16 %v1451_v11, %v1450_v10 }
 0x2a0   :  { %2259 = vmatprep.subr.bf16.mxu0 %v2258_v16  ;;  %2291 = vmatprep.subr.bf16.mxu1 %v2290_v17  ;;  %v1435_v16 = vld [vmem:[#allocation10 + $0x78] sm:$0xff]  ;;  %v2310_v17 = vpack.c.bf16 %v1483_v14, %v1482_v12 }
 0x2a1   :  { %v2280_v18 = vpack.c.bf16 %v1435_v16, %v1434_v15 }
 0x2a3   :  { %2261 = vmatpush3.bf16.msra.mxu0 %v2260_v25  ;;  %2293 = vmatpush3.bf16.msra.mxu1 %v2292_v26  ;;  %v1123_v25 = vrot.slane %v1110_v22, %v2638_v44  ;;  %v1119_v26 = vrot.slane %v1110_v22, %v2624_v36 }
 0x2a4   :  { %2263 = vmatprep.subr.bf16.mxu0 %v2262_v29  ;;  %2295 = vmatprep.subr.bf16.mxu1 %v2294_v30 }
 0x2a7   :  { %2265 = vmatpush3.bf16.msra.mxu0 %v2264_v42  ;;  %2297 = vmatpush3.bf16.msra.mxu1 %v2296_v43 }
 0x2a8   :  { %2267 = vmatprep.subr.bf16.mxu0 %v2266_v47  ;;  %2299 = vmatprep.subr.bf16.mxu1 %v2298_v48 }
 0x2ab   :  { %2269 = vmatpush3.bf16.msra.mxu0 %v2268_v56  ;;  %2301 = vmatpush3.bf16.msra.mxu1 %v2300_v57 }
 0x2ac   :  { %2271 = vmatprep.subr.bf16.mxu0 %v2270_v33  ;;  %2303 = vmatprep.subr.bf16.mxu1 %v2302_v59 }
 0x2af   :  { %2273 = vmatpush3.bf16.msra.mxu0 %v2272_v2  ;;  %2305 = vmatpush3.bf16.msra.mxu1 %v2304_v3 }
 0x2b0   :  { %2275 = vmatprep.subr.bf16.mxu0 %v2274_v4  ;;  %2307 = vmatprep.subr.bf16.mxu1 %v2306_v5 }
 0x2b3   :  { %2277 = vmatpush3.bf16.msra.mxu0 %v2276_v7  ;;  %2309 = vmatpush3.bf16.msra.mxu1 %v2308_v9 }
 0x2b4   :  { %2279 = vmatprep.subr.bf16.mxu0 %v2278_v13  ;;  %2311 = vmatprep.subr.bf16.mxu1 %v2310_v17 }
 0x2b7   :  { %2281 = vmatpush3.bf16.msra.mxu0 %v2280_v18  ;;  %2313 = vmatpush3.bf16.msra.mxu1 %v2312_v21 }
 0x36d   :  { %v1269_v28 = vpop.f32.mrb[4].mxu0  ;;  %v1411_v29 = vpop.f32.mrb[4].mxu1 }
 0x36e   :  { %v2318_v30 = vadd.f32 %v1269_v28, %v1115_v24  ;;  %v2320_v31 = vadd.f32 %v1411_v29, %v1123_v25  ;;  %v1271_v32 = vpop.f32.mrb[5].mxu0  ;;  %v1413_v37 = vpop.f32.mrb[5].mxu1 }
 0x36f   :  { %v2319_v39 = vadd.f32 %v1271_v32, %v1119_v26  ;;  %v2321_v40 = vadd.f32 %v1413_v37, %v1127_v27 }
 0x370   :  { %v1416_v43 = vmax.f32 %v2318_v30, 0.0  ;;  %v1418_v45 = vmax.f32 %v2320_v31, 0.0 }
 0x371   :  { %v1417_v41 = vmax.f32 %v2319_v39, 0.0  ;;  %v1419_v42 = vmax.f32 %v2321_v40, 0.0 }
 0x373   :  { %1555 = vmatprep.mubr.f32.mxu0 %v1417_v41  ;;  %1625 = vmatprep.mubr.f32.mxu1 %v1419_v42 }
 0x374   :  { %1556 = vmatmul.mubr.f32.vlgmr.msra.gmra.mrb[6].mxu0 %v1416_v43  ;;  %1626 = vmatmul.mubr.f32.vlgmr.msra.gmra.mrb[6].mxu1 %v1418_v45 }
 0x447   :  { %v1684_v34 = vpop.f32.mrb[6].mxu0  ;;  %v1719_v36 = vpop.f32.mrb[6].mxu1 }
 0x448   :  { %v1685_v44 = vpop.f32.mrb[7].mxu0  ;;  %v1720_v46 = vpop.f32.mrb[7].mxu1 }
 0x449   :  { %v1686_v47 = vadd.f32 %v1685_v44, %v1684_v34  ;;  %v1721_v48 = vadd.f32 %v1720_v46, %v1719_v36 }
 0x44b   :  { %v1558_v49 = vadd.f32 %v1686_v47, %v1651_v38 }
 0x44d   :  { %v1628_v50 = vadd.f32 %v1721_v48, %v1558_v49 }
 0x44f   :  { %1631 = vst [vmem:[#allocation11] sm:$0xff] %v1628_v50 }
 0x450   :  { %2462 = shalt.err (!%p2459_p2)
}
 0x451   :  { %s2463_s8 = scalar_lea.hbm %s2690_s9, 128 }
 0x452   :  { %p2464_p3 = scmp.ne.s32.totalorder %s2690_s9, %s2463_s8  ;;  %p2467_p4 = scmp.lt.u32.totalorder %s2463_s8, %s2690_s9 }
 0x454   :  { %p2469_p5 = pnand %p2467_p4, %p2464_p3 }
 0x456   :  { %2472 = shalt.err (!%p2469_p5)
}
 0x457   :  { %1641 = dma.vmem_to_hbm [thread:$0]  %s1639_s13, 128, %s2690_s9, [#allocation4]  }
 0x458   :  { %2479 = dma.done.wait [#allocation4], 128  }
 0x459   :  { %2480 = vsyncadd [#allocation4], 4294967168 }
 0x45a   :  { %1645 = vsyncpa [#allocation3], 1 }
 0x45b   :  { %1646 = vsyncpa [#allocation6], 1 }
 0x45c   :  { %1647 = vsyncpa [#allocation9], 1 }
 0x45d   :  { %1648 = vsyncpa [#allocation4], 1 }

</bundles_post_ra>
